<compile_context>
chip_gen: v7x
topology: tpu7x:2x2x1
jax: 0.10.0
libtpu: 0.0.40
codegen_flags: <defaults>
</compile_context>

<pallas_src>
import functools

import jax
import jax.numpy as jnp
from jax.experimental import pallas as pl
from jax.experimental.pallas import tpu as pltpu

# ----------------------------- observation config (k_neighbors=2, k_obstacles=2)
K_NEIGH = 2
K_OBST = 2
NEIGH_DIM = 6                                   # per-neighbor key dim
NEIGH_VAL_DIM = 7                               # per-neighbor value dim (torch reshape(N, K, 7))
OBST_DIM = 2                                    # per-obstacle key/value dim
NB_START = 12
NB_END = NB_START + K_NEIGH * NEIGH_DIM         # 24
NP_END = NB_END + K_NEIGH                       # 26
OB_END = NP_END + K_OBST * OBST_DIM             # 30
OBS_DIM = OB_END + 7                            # 37
QUERY_DIM = NB_START + (OBS_DIM - OB_END)       # 19
N_CAND = K_NEIGH + K_OBST                       # 4 distance candidates

MLP_HIDDEN = 256
OUT_PAD = 128        # lane-dense padded output width (>= n_agent_outputs)
TILE_ROWS = 512      # VMEM-safe sweet spot on v5e / v6e / v7x


def _round_up(n, m):
    return ((n + m - 1) // m) * m


def _device_kind():
    try:
        return jax.devices()[0].device_kind.lower()
    except Exception:
        return ""


def _is_v5e(kind):
    return ("v5e" in kind) or ("v5 lite" in kind) or ("v5lite" in kind)


def _is_v7x(kind):
    return "v7" in kind


# ----------------------------- fused GATActor kernel -------------------------
def _gat_actor_kernel(x_ref, dconst_ref, w0p_ref, b0p_ref, hsum2_ref,
                      wout0_ref, bout0_ref, wl1_ref, bl1_ref,
                      wm1_ref, bm1_ref, wm2_ref, bm2_ref, wm3_ref, bm3_ref,
                      out_ref, *, heads, hidden, scale, pair_scores):
    f32 = jnp.float32
    bf16 = jnp.bfloat16
    HC = heads * hidden

    x = x_ref[...]                                              # (T, 37) f32

    # ---- layer-0 fused projection: one bf16 MXU pass, f32 accumulate -------
    # column blocks (HC lanes each):
    #   [q | ak0 ak1 | ok0 ok1 | av0 av1 | ov0 ov1 | dx0..dx3 dy0..dy3 pad]
    proj0 = jnp.dot(x.astype(bf16), w0p_ref[...],
                    preferred_element_type=f32) + b0p_ref[...]
    q0 = proj0[:, 0:HC]
    av = [proj0[:, (5 + k) * HC:(6 + k) * HC] for k in range(K_NEIGH)]
    ov = [proj0[:, (7 + k) * HC:(8 + k) * HC] for k in range(K_OBST)]

    # ---- packed distance decays: ONE sqrt + ONE exp over 4 candidate lanes --
    d = proj0[:, 9 * HC:9 * HC + 2 * N_CAND]                    # (T, 8) deltas
    dsq = d * d
    dist = jnp.sqrt(dsq[:, 0:N_CAND] + dsq[:, N_CAND:2 * N_CAND])      # (T, 4)
    # decay (+softmax eps for neighbors), attention scale folded in
    dw = (jnp.exp(-dconst_ref[0:1, 0:N_CAND] * dist)
          + dconst_ref[1:2, 0:N_CAND]) * scale                  # (T, 4)
    dwn = [dw[:, k:k + 1] for k in range(K_NEIGH)]
    dwo = [dw[:, K_NEIGH + k:K_NEIGH + k + 1] for k in range(K_OBST)]

    # ---- per-head attention scores via head-sum broadcast matmul -----------
    # (q * k) @ hsum gives each head's dot product broadcast across that
    # head's C lanes: attention stays fully lane-parallel (no XLU reductions).
    if pair_scores:
        # 256-wide pass computes both candidates of a pair at once (v6e/v7x).
        q2 = jnp.concatenate([q0, q0], axis=-1)                 # (T, 2*HC)
        sn = jnp.dot((q2 * proj0[:, 1 * HC:3 * HC]).astype(bf16),
                     hsum2_ref[...], preferred_element_type=f32)
        so = jnp.dot((q2 * proj0[:, 3 * HC:5 * HC]).astype(bf16),
                     hsum2_ref[...], preferred_element_type=f32)
        sn = [sn[:, 0:HC], sn[:, HC:2 * HC]]
        so = [so[:, 0:HC], so[:, HC:2 * HC]]
    else:
        # v5e: separate 128-wide passes (256-wide would cost 4 MXU tiles).
        h1 = hsum2_ref[0:HC, 0:HC]
        sn = [jnp.dot((q0 * proj0[:, (1 + k) * HC:(2 + k) * HC]).astype(bf16),
                      h1, preferred_element_type=f32) for k in range(K_NEIGH)]
        so = [jnp.dot((q0 * proj0[:, (3 + k) * HC:(4 + k) * HC]).astype(bf16),
                      h1, preferred_element_type=f32) for k in range(K_OBST)]

    # ---- K=2 softmax in closed form (1 exp + 1 approx reciprocal, EUP) -----
    def attend2(s, w, v):
        l0, l1 = s[0] * w[0], s[1] * w[1]                       # (T, HC)
        dlt = l0 - l1
        e = jnp.exp(-jnp.abs(dlt))
        wmax = pl.reciprocal(1.0 + e, approx=True)              # weight of larger logit
        p0 = jnp.where(dlt >= 0.0, wmax, 1.0 - wmax)
        return p0 * v[0] + (1.0 - p0) * v[1]

    att_a0 = attend2(sn, dwn, av)
    att_o0 = attend2(so, dwo, ov)

    # ---- layer-0 output: agent/obstacle/final projections folded offline ---
    att = jnp.concatenate([att_a0, att_o0], axis=-1).astype(bf16)   # (T, 2*HC)
    x1 = jnp.maximum(jnp.dot(att, wout0_ref[...],
                             preferred_element_type=f32) + bout0_ref[...], 0.0)
    # TODO(synk): inter-layer F.dropout(p=0.1) skipped (eval-mode semantics).

    # ---- layer 1: attention is the exact identity on the k-shared values,
    # so the entire second PGAT layer folds (offline) into one (C,C) linear ---
    x2 = jnp.maximum(jnp.dot(x1.astype(bf16), wl1_ref[...],
                             preferred_element_type=f32) + bl1_ref[...], 0.0)
    # TODO(synk): F.dropout(p=0.1) after layer 1 also skipped (eval mode).

    # ---- output MLP ----------------------------------------------------------
    h = jnp.maximum(jnp.dot(x2.astype(bf16), wm1_ref[...],
                            preferred_element_type=f32) + bm1_ref[...], 0.0)
    h = jnp.maximum(jnp.dot(h.astype(bf16), wm2_ref[...],
                            preferred_element_type=f32) + bm2_ref[...], 0.0)
    out_ref[...] = (jnp.dot(h.astype(bf16), wm3_ref[...],
                            preferred_element_type=f32) + bm3_ref[...])


# ----------------------------- deterministic parameter init ------------------
def _xavier(key, fan_in, fan_out):
    # PyTorch Linear weight is (out, in) with xavier_uniform; stored here
    # pre-transposed as (in, out) so everything computes x @ W + b.
    bound = (6.0 / (fan_in + fan_out)) ** 0.5
    return jax.random.uniform(key, (fan_in, fan_out), jnp.float32, -bound, bound)


def init_pgat_params(key, dq, dak, dav, dok, dov, heads, out_ch,
                     c_agent=1.0, c_obst=2.0):
    hc = heads * out_ch
    ks = jax.random.split(key, 8)
    z = lambda n: jnp.zeros((1, n), jnp.float32)
    return dict(
        wq=_xavier(ks[0], dq, hc), bq=z(hc),
        wak=_xavier(ks[1], dak, hc), bak=z(hc),
        wav=_xavier(ks[2], dav, hc), bav=z(hc),
        wok=_xavier(ks[3], dok, hc), bok=z(hc),
        wov=_xavier(ks[4], dov, hc), bov=z(hc),
        wap=_xavier(ks[5], hc, out_ch), bap=z(out_ch),
        wop=_xavier(ks[6], hc, out_ch), bop=z(out_ch),
        wf=_xavier(ks[7], 2 * out_ch, out_ch), bf=z(out_ch),
        c_agent=jnp.asarray(max(c_agent, 0.1), jnp.float32),
        c_obstacle=jnp.asarray(max(c_obst, 0.1), jnp.float32),
    )


def init_gat_actor_params(key, *, hidden, heads, n_out):
    k0, k1, k2, k3, k4, k5, k6 = jax.random.split(key, 7)
    z = lambda n: jnp.zeros((1, n), jnp.float32)
    return dict(
        pgat0=init_pgat_params(k0, QUERY_DIM, NEIGH_DIM, NEIGH_VAL_DIM,
                               OBST_DIM, OBST_DIM, heads, hidden),
        pgat1=init_pgat_params(k1, hidden, hidden, hidden, hidden, hidden,
                               heads, hidden),
        neigh_proj_w=_xavier(k2, hidden, hidden), neigh_proj_b=z(hidden),
        obst_proj_w=_xavier(k3, hidden, hidden), obst_proj_b=z(hidden),
        mlp_w1=_xavier(k4, hidden, MLP_HIDDEN), mlp_b1=z(MLP_HIDDEN),
        mlp_w2=_xavier(k5, MLP_HIDDEN, MLP_HIDDEN), mlp_b2=z(MLP_HIDDEN),
        mlp_w3=_xavier(k6, MLP_HIDDEN, n_out), mlp_b3=z(n_out),
    )


# ----------------------------- parameter packing (plain JAX, one time) -------
def pack_gat_actor_params(p, *, heads, hidden, n_out):
    f32, bf16 = jnp.float32, jnp.bfloat16
    C = hidden
    HC = heads * hidden
    assert n_out <= OUT_PAD
    P0, P1 = p['pgat0'], p['pgat1']

    # --- layer-0 fused projection weight (OBS_DIM x 10*HC): columns are
    # [q | ak0 ak1 | ok0 ok1 | av0 av1 | ov0 ov1 | position deltas (8) | pad]
    w0p = jnp.zeros((OBS_DIM, 10 * HC), f32)
    # query = obs[:, 0:12] ++ obs[:, 30:37]
    w0p = w0p.at[0:NB_START, 0:HC].set(P0['wq'][0:NB_START, :])
    w0p = w0p.at[OB_END:OBS_DIM, 0:HC].set(P0['wq'][NB_START:, :])
    for k in range(K_NEIGH):
        r = NB_START + NEIGH_DIM * k                     # neighbor-k key cols
        w0p = w0p.at[r:r + NEIGH_DIM, (1 + k) * HC:(2 + k) * HC].set(P0['wak'])
        # value-k rows follow torch's reshape(N, K, 7) of [neighbor_block | progress]
        r = NB_START + NEIGH_VAL_DIM * k
        w0p = w0p.at[r:r + NEIGH_VAL_DIM, (5 + k) * HC:(6 + k) * HC].set(P0['wav'])
    for k in range(K_OBST):
        r = NP_END + OBST_DIM * k
        w0p = w0p.at[r:r + OBST_DIM, (3 + k) * HC:(4 + k) * HC].set(P0['wok'])
        w0p = w0p.at[r:r + OBST_DIM, (7 + k) * HC:(8 + k) * HC].set(P0['wov'])
    # delta columns: lane base+j = agent_x - cand_j_x, base+4+j = agent_y - cand_j_y
    base = 9 * HC
    cand_cols = ([NB_START + NEIGH_DIM * k for k in range(K_NEIGH)]
                 + [NP_END + OBST_DIM * k for k in range(K_OBST)])
    for j, c in enumerate(cand_cols):
        w0p = w0p.at[0, base + j].set(1.0).at[c, base + j].set(-1.0)
        w0p = w0p.at[1, base + N_CAND + j].set(1.0).at[c + 1, base + N_CAND + j].set(-1.0)

    b0p = jnp.zeros((1, 10 * HC), f32)
    b0p = b0p.at[:, 0:HC].set(P0['bq'])
    for k in range(K_NEIGH):
        b0p = b0p.at[:, (1 + k) * HC:(2 + k) * HC].set(P0['bak'])
        b0p = b0p.at[:, (5 + k) * HC:(6 + k) * HC].set(P0['bav'])
    for k in range(K_OBST):
        b0p = b0p.at[:, (3 + k) * HC:(4 + k) * HC].set(P0['bok'])
        b0p = b0p.at[:, (7 + k) * HC:(8 + k) * HC].set(P0['bov'])

    # --- head-sum broadcast matrix, block-diag paired for 256-wide passes
    hsum = jnp.kron(jnp.eye(heads, dtype=f32), jnp.ones((hidden, hidden), f32))
    zero = jnp.zeros_like(hsum)
    hsum2 = jnp.block([[hsum, zero], [zero, hsum]])             # (2*HC, 2*HC)

    # --- layer-0 output: fold agent_proj / obstacle_proj into final_proj (exact)
    wf_a, wf_b = P0['wf'][0:C, :], P0['wf'][C:2 * C, :]
    wout0 = jnp.concatenate([P0['wap'] @ wf_a, P0['wop'] @ wf_b], axis=0)  # (2*HC, C)
    bout0 = P0['bap'] @ wf_a + P0['bop'] @ wf_b + P0['bf']                 # (1, C)

    # --- layer 1: keys/values are shared across candidates, so attention is
    # the exact identity on the values; the whole layer (neighbor/obstacle
    # projections -> value projections -> head projections -> final_proj)
    # folds into a single (C, C) linear + bias.
    wf1_a, wf1_b = P1['wf'][0:C, :], P1['wf'][C:2 * C, :]
    wa = p['neigh_proj_w'] @ P1['wav'] @ P1['wap'] @ wf1_a
    ba = ((p['neigh_proj_b'] @ P1['wav'] + P1['bav']) @ P1['wap'] + P1['bap']) @ wf1_a
    wo = p['obst_proj_w'] @ P1['wov'] @ P1['wop'] @ wf1_b
    bo = ((p['obst_proj_b'] @ P1['wov'] + P1['bov']) @ P1['wop'] + P1['bop']) @ wf1_b
    wl1 = wa + wo                                                          # (C, C)
    bl1 = ba + bo + P1['bf']                                               # (1, C)

    # --- output MLP; last layer padded to a 128-lane-dense slab (not 256)
    wm3 = jnp.zeros((MLP_HIDDEN, OUT_PAD), f32).at[:, :n_out].set(p['mlp_w3'])
    bm3 = jnp.zeros((1, OUT_PAD), f32).at[:, :n_out].set(p['mlp_b3'])

    # --- distance-decay constants / softmax eps, one lane per candidate
    dconst = jnp.zeros((2, 128), f32)
    dconst = dconst.at[0, 0:K_NEIGH].set(P0['c_agent'])
    dconst = dconst.at[0, K_NEIGH:N_CAND].set(P0['c_obstacle'])
    dconst = dconst.at[1, 0:K_NEIGH].set(1e-8)       # reference adds eps only for neighbors

    return dict(
        dconst=dconst,
        w0p=w0p.astype(bf16), b0p=b0p,
        hsum2=hsum2.astype(bf16),
        wout0=wout0.astype(bf16), bout0=bout0,
        wl1=wl1.astype(bf16), bl1=bl1,
        wm1=p['mlp_w1'].astype(bf16), bm1=p['mlp_b1'],
        wm2=p['mlp_w2'].astype(bf16), bm2=p['mlp_b2'],
        wm3=wm3.astype(bf16), bm3=bm3,
    )


# ----------------------------- full GATActor forward -------------------------
def gat_actor_forward(obs, packed, *, heads, hidden, n_out,
                      tile_rows=TILE_ROWS, pair_scores=None):
    B, A, D = obs.shape
    assert D == OBS_DIM
    N = B * A
    x = obs.reshape(N, D).astype(jnp.float32)

    kind = _device_kind()
    if pair_scores is None:
        # 256-wide paired score passes only pay off on 256x256 MXUs (v6e/v7x)
        pair_scores = not _is_v5e(kind)

    # pad rows to the f32 sublane tile (8) / the row tile when gridding
    tile = tile_rows if N > tile_rows else max(_round_up(N, 8), 8)
    n_pad = _round_up(N, tile)
    steps = n_pad // tile
    if _is_v7x(kind) and steps > 1 and steps % 2 == 1:
        steps += 1                                   # keep both v7x TCs busy
        n_pad = steps * tile
    if n_pad != N:
        x = jnp.pad(x, ((0, n_pad - N), (0, 0)))

    scale = float((hidden // heads) ** (-0.5))       # matches the torch reference
    kern = functools.partial(_gat_actor_kernel, heads=heads, hidden=hidden,
                             scale=scale, pair_scores=pair_scores)

    def full(a):
        return pl.BlockSpec(a.shape, lambda i: (0,) * a.ndim)

    names = ('dconst', 'w0p', 'b0p', 'hsum2', 'wout0', 'bout0', 'wl1', 'bl1',
             'wm1', 'bm1', 'wm2', 'bm2', 'wm3', 'bm3')
    weights = [packed[n] for n in names]

    out = pl.pallas_call(
        kern,
        out_shape=jax.ShapeDtypeStruct((n_pad, OUT_PAD), jnp.float32),
        grid=(steps,),
        in_specs=[pl.BlockSpec((tile, OBS_DIM), lambda i: (i, 0))]
                 + [full(w) for w in weights],
        out_specs=pl.BlockSpec((tile, OUT_PAD), lambda i: (i, 0)),
        compiler_params=pltpu.CompilerParams(
            dimension_semantics=("parallel",),
            vmem_limit_bytes=48 * 1024 * 1024),
    )(x, *weights)

    return out[:N, :n_out].reshape(B, A, n_out)


# ----------------------------- main -------------------------------------------
if __name__ == "__main__":
    HIDDEN = 32          # gnn_hidden_dim
    HEADS = 4            # n_attention_heads (HEADS*HIDDEN = 128 -> lane aligned)
    N_OUT = 2            # n_agent_outputs
    BATCH, N_AGENTS = 2, 4

    key = jax.random.PRNGKey(0)
    k_obs, k_par = jax.random.split(key)
    obs = jax.random.normal(k_obs, (BATCH, N_AGENTS, OBS_DIM), jnp.float32)
    params = init_gat_actor_params(k_par, hidden=HIDDEN, heads=HEADS, n_out=N_OUT)
    packed = pack_gat_actor_params(params, heads=HEADS, hidden=HIDDEN, n_out=N_OUT)

    fwd = jax.jit(functools.partial(gat_actor_forward,
                                    heads=HEADS, hidden=HIDDEN, n_out=N_OUT))
    out = jax.block_until_ready(fwd(obs, packed))
    assert out.shape == (BATCH, N_AGENTS, N_OUT)
    assert bool(jnp.all(jnp.isfinite(out)))
    print("KERNEL_OK")
</pallas_src>

<mosaic_0001>
module attributes {stable_mosaic.version = 11 : i64} {
  func.func @_gat_actor_kernel(%arg0: i32, %arg1: memref<8x37xf32, #tpu.memory_space<vmem>>, %arg2: memref<2x128xf32, #tpu.memory_space<vmem>>, %arg3: memref<37x1280xbf16, #tpu.memory_space<vmem>>, %arg4: memref<1x1280xf32, #tpu.memory_space<vmem>>, %arg5: memref<256x256xbf16, #tpu.memory_space<vmem>>, %arg6: memref<256x32xbf16, #tpu.memory_space<vmem>>, %arg7: memref<1x32xf32, #tpu.memory_space<vmem>>, %arg8: memref<32x32xbf16, #tpu.memory_space<vmem>>, %arg9: memref<1x32xf32, #tpu.memory_space<vmem>>, %arg10: memref<32x256xbf16, #tpu.memory_space<vmem>>, %arg11: memref<1x256xf32, #tpu.memory_space<vmem>>, %arg12: memref<256x256xbf16, #tpu.memory_space<vmem>>, %arg13: memref<1x256xf32, #tpu.memory_space<vmem>>, %arg14: memref<256x128xbf16, #tpu.memory_space<vmem>>, %arg15: memref<1x128xf32, #tpu.memory_space<vmem>>, %arg16: memref<8x128xf32, #tpu.memory_space<vmem>>) attributes {dimension_semantics = [#tpu.dimension_semantics<parallel>], iteration_bounds = array<i64: 1>, scalar_prefetch = 0 : i64, scratch_operands = 0 : i64, tpu.core_type = #tpu.core_type<tc>, window_params = [{transform_indices = @transform_0, window_bounds = array<i64: 8, 37>}, {pipeline_mode = #tpu.pipeline_mode<synchronous>, transform_indices = @transform_1, window_bounds = array<i64: 2, 128>}, {pipeline_mode = #tpu.pipeline_mode<synchronous>, transform_indices = @transform_2, window_bounds = array<i64: 37, 1280>}, {pipeline_mode = #tpu.pipeline_mode<synchronous>, transform_indices = @transform_3, window_bounds = array<i64: 1, 1280>}, {pipeline_mode = #tpu.pipeline_mode<synchronous>, transform_indices = @transform_4, window_bounds = array<i64: 256, 256>}, {pipeline_mode = #tpu.pipeline_mode<synchronous>, transform_indices = @transform_5, window_bounds = array<i64: 256, 32>}, {pipeline_mode = #tpu.pipeline_mode<synchronous>, transform_indices = @transform_6, window_bounds = array<i64: 1, 32>}, {pipeline_mode = #tpu.pipeline_mode<synchronous>, transform_indices = @transform_7, window_bounds = array<i64: 32, 32>}, {pipeline_mode = #tpu.pipeline_mode<synchronous>, transform_indices = @transform_8, window_bounds = array<i64: 1, 32>}, {pipeline_mode = #tpu.pipeline_mode<synchronous>, transform_indices = @transform_9, window_bounds = array<i64: 32, 256>}, {pipeline_mode = #tpu.pipeline_mode<synchronous>, transform_indices = @transform_10, window_bounds = array<i64: 1, 256>}, {pipeline_mode = #tpu.pipeline_mode<synchronous>, transform_indices = @transform_11, window_bounds = array<i64: 256, 256>}, {pipeline_mode = #tpu.pipeline_mode<synchronous>, transform_indices = @transform_12, window_bounds = array<i64: 1, 256>}, {pipeline_mode = #tpu.pipeline_mode<synchronous>, transform_indices = @transform_13, window_bounds = array<i64: 256, 128>}, {pipeline_mode = #tpu.pipeline_mode<synchronous>, transform_indices = @transform_14, window_bounds = array<i64: 1, 128>}, {transform_indices = @transform_15, window_bounds = array<i64: 8, 128>}]} {
    %c0 = arith.constant 0 : index
    %c0_0 = arith.constant 0 : index
    %0 = vector.load %arg1[%c0, %c0_0] : memref<8x37xf32, #tpu.memory_space<vmem>>, vector<8x37xf32>
    %1 = arith.truncf %0 : vector<8x37xf32> to vector<8x37xbf16>
    %c0_1 = arith.constant 0 : index
    %c0_2 = arith.constant 0 : index
    %2 = vector.load %arg3[%c0_1, %c0_2] : memref<37x1280xbf16, #tpu.memory_space<vmem>>, vector<37x1280xbf16>
    %cst = arith.constant dense<0.000000e+00> : vector<8x1280xf32>
    %3 = tpu.matmul %1, %2, %cst {dimension_numbers = #tpu.dot_dimension_numbers<[1], [0], [0], [1], [0, 0, 1, 1], [], []>} : vector<8x37xbf16>, vector<37x1280xbf16>, vector<8x1280xf32> -> vector<8x1280xf32>
    %c0_3 = arith.constant 0 : index
    %c0_4 = arith.constant 0 : index
    %4 = vector.load %arg4[%c0_3, %c0_4] : memref<1x1280xf32, #tpu.memory_space<vmem>>, vector<1x1280xf32>
    %5 = vector.broadcast %4 : vector<1x1280xf32> to vector<8x1280xf32>
    %6 = arith.addf %3, %5 : vector<8x1280xf32>
    %7 = vector.extract_strided_slice %6 {offsets = [0, 0], sizes = [8, 128], strides = [1, 1]} : vector<8x1280xf32> to vector<8x128xf32>
    %8 = vector.extract_strided_slice %6 {offsets = [0, 640], sizes = [8, 128], strides = [1, 1]} : vector<8x1280xf32> to vector<8x128xf32>
    %9 = vector.extract_strided_slice %6 {offsets = [0, 768], sizes = [8, 128], strides = [1, 1]} : vector<8x1280xf32> to vector<8x128xf32>
    %10 = vector.extract_strided_slice %6 {offsets = [0, 896], sizes = [8, 128], strides = [1, 1]} : vector<8x1280xf32> to vector<8x128xf32>
    %11 = vector.extract_strided_slice %6 {offsets = [0, 1024], sizes = [8, 128], strides = [1, 1]} : vector<8x1280xf32> to vector<8x128xf32>
    %12 = vector.extract_strided_slice %6 {offsets = [0, 1152], sizes = [8, 8], strides = [1, 1]} : vector<8x1280xf32> to vector<8x8xf32>
    %13 = arith.mulf %12, %12 : vector<8x8xf32>
    %14 = vector.extract_strided_slice %13 {offsets = [0, 0], sizes = [8, 4], strides = [1, 1]} : vector<8x8xf32> to vector<8x4xf32>
    %15 = vector.extract_strided_slice %13 {offsets = [0, 4], sizes = [8, 4], strides = [1, 1]} : vector<8x8xf32> to vector<8x4xf32>
    %16 = arith.addf %14, %15 : vector<8x4xf32>
    %17 = math.sqrt %16 : vector<8x4xf32>
    %c0_5 = arith.constant 0 : index
    %c0_6 = arith.constant 0 : index
    %18 = vector.load %arg2[%c0_5, %c0_6] : memref<2x128xf32, #tpu.memory_space<vmem>>, vector<1x4xf32>
    %cst_7 = arith.constant 0.000000e+00 : f32
    %19 = vector.broadcast %cst_7 : f32 to vector<1x4xf32>
    %20 = arith.subf %19, %18 : vector<1x4xf32>
    %21 = vector.broadcast %20 : vector<1x4xf32> to vector<8x4xf32>
    %22 = arith.mulf %21, %17 : vector<8x4xf32>
    %23 = math.exp %22 : vector<8x4xf32>
    %c1 = arith.constant 1 : index
    %c0_8 = arith.constant 0 : index
    %24 = vector.load %arg2[%c1, %c0_8] : memref<2x128xf32, #tpu.memory_space<vmem>>, vector<1x4xf32>
    %25 = vector.broadcast %24 : vector<1x4xf32> to vector<8x4xf32>
    %26 = arith.addf %23, %25 : vector<8x4xf32>
    %cst_9 = arith.constant 0.353553385 : f32
    %27 = vector.broadcast %cst_9 : f32 to vector<8x4xf32>
    %28 = arith.mulf %26, %27 : vector<8x4xf32>
    %29 = vector.extract_strided_slice %28 {offsets = [0, 0], sizes = [8, 1], strides = [1, 1]} : vector<8x4xf32> to vector<8x1xf32>
    %30 = vector.extract_strided_slice %28 {offsets = [0, 1], sizes = [8, 1], strides = [1, 1]} : vector<8x4xf32> to vector<8x1xf32>
    %31 = vector.extract_strided_slice %28 {offsets = [0, 2], sizes = [8, 1], strides = [1, 1]} : vector<8x4xf32> to vector<8x1xf32>
    %32 = vector.extract_strided_slice %28 {offsets = [0, 3], sizes = [8, 1], strides = [1, 1]} : vector<8x4xf32> to vector<8x1xf32>
    %33 = tpu.concatenate %7, %7 in 1 : vector<8x128xf32>, vector<8x128xf32> -> vector<8x256xf32>
    %34 = vector.extract_strided_slice %6 {offsets = [0, 128], sizes = [8, 256], strides = [1, 1]} : vector<8x1280xf32> to vector<8x256xf32>
    %35 = arith.mulf %33, %34 : vector<8x256xf32>
    %36 = arith.truncf %35 : vector<8x256xf32> to vector<8x256xbf16>
    %c0_10 = arith.constant 0 : index
    %c0_11 = arith.constant 0 : index
    %37 = vector.load %arg5[%c0_10, %c0_11] : memref<256x256xbf16, #tpu.memory_space<vmem>>, vector<256x256xbf16>
    %cst_12 = arith.constant dense<0.000000e+00> : vector<8x256xf32>
    %38 = tpu.matmul %36, %37, %cst_12 {dimension_numbers = #tpu.dot_dimension_numbers<[1], [0], [0], [1], [0, 0, 1, 1], [], []>} : vector<8x256xbf16>, vector<256x256xbf16>, vector<8x256xf32> -> vector<8x256xf32>
    %39 = vector.extract_strided_slice %6 {offsets = [0, 384], sizes = [8, 256], strides = [1, 1]} : vector<8x1280xf32> to vector<8x256xf32>
    %40 = arith.mulf %33, %39 : vector<8x256xf32>
    %41 = arith.truncf %40 : vector<8x256xf32> to vector<8x256xbf16>
    %c0_13 = arith.constant 0 : index
    %c0_14 = arith.constant 0 : index
    %42 = vector.load %arg5[%c0_13, %c0_14] : memref<256x256xbf16, #tpu.memory_space<vmem>>, vector<256x256xbf16>
    %cst_15 = arith.constant dense<0.000000e+00> : vector<8x256xf32>
    %43 = tpu.matmul %41, %42, %cst_15 {dimension_numbers = #tpu.dot_dimension_numbers<[1], [0], [0], [1], [0, 0, 1, 1], [], []>} : vector<8x256xbf16>, vector<256x256xbf16>, vector<8x256xf32> -> vector<8x256xf32>
    %44 = vector.extract_strided_slice %38 {offsets = [0, 0], sizes = [8, 128], strides = [1, 1]} : vector<8x256xf32> to vector<8x128xf32>
    %45 = vector.extract_strided_slice %38 {offsets = [0, 128], sizes = [8, 128], strides = [1, 1]} : vector<8x256xf32> to vector<8x128xf32>
    %46 = vector.extract_strided_slice %43 {offsets = [0, 0], sizes = [8, 128], strides = [1, 1]} : vector<8x256xf32> to vector<8x128xf32>
    %47 = vector.extract_strided_slice %43 {offsets = [0, 128], sizes = [8, 128], strides = [1, 1]} : vector<8x256xf32> to vector<8x128xf32>
    %48 = vector.broadcast %29 : vector<8x1xf32> to vector<8x128xf32>
    %49 = arith.mulf %44, %48 : vector<8x128xf32>
    %50 = vector.broadcast %30 : vector<8x1xf32> to vector<8x128xf32>
    %51 = arith.mulf %45, %50 : vector<8x128xf32>
    %52 = arith.subf %49, %51 : vector<8x128xf32>
    %53 = math.absf %52 : vector<8x128xf32>
    %cst_16 = arith.constant 0.000000e+00 : f32
    %54 = vector.broadcast %cst_16 : f32 to vector<8x128xf32>
    %55 = arith.subf %54, %53 : vector<8x128xf32>
    %56 = math.exp %55 : vector<8x128xf32>
    %cst_17 = arith.constant 1.000000e+00 : f32
    %57 = vector.broadcast %cst_17 : f32 to vector<8x128xf32>
    %58 = arith.addf %57, %56 : vector<8x128xf32>
    %59 = tpu.reciprocal %58 {approx = true} : vector<8x128xf32> -> vector<8x128xf32>
    %cst_18 = arith.constant 0.000000e+00 : f32
    %60 = vector.broadcast %cst_18 : f32 to vector<8x128xf32>
    %61 = arith.cmpf oge, %52, %60 : vector<8x128xf32>
    %cst_19 = arith.constant 1.000000e+00 : f32
    %62 = vector.broadcast %cst_19 : f32 to vector<8x128xf32>
    %63 = arith.subf %62, %59 : vector<8x128xf32>
    %64 = arith.select %61, %59, %63 : vector<8x128xi1>, vector<8x128xf32>
    %65 = arith.mulf %64, %8 : vector<8x128xf32>
    %cst_20 = arith.constant 1.000000e+00 : f32
    %66 = vector.broadcast %cst_20 : f32 to vector<8x128xf32>
    %67 = arith.subf %66, %64 : vector<8x128xf32>
    %68 = arith.mulf %67, %9 : vector<8x128xf32>
    %69 = arith.addf %65, %68 : vector<8x128xf32>
    %70 = vector.broadcast %31 : vector<8x1xf32> to vector<8x128xf32>
    %71 = arith.mulf %46, %70 : vector<8x128xf32>
    %72 = vector.broadcast %32 : vector<8x1xf32> to vector<8x128xf32>
    %73 = arith.mulf %47, %72 : vector<8x128xf32>
    %74 = arith.subf %71, %73 : vector<8x128xf32>
    %75 = math.absf %74 : vector<8x128xf32>
    %cst_21 = arith.constant 0.000000e+00 : f32
    %76 = vector.broadcast %cst_21 : f32 to vector<8x128xf32>
    %77 = arith.subf %76, %75 : vector<8x128xf32>
    %78 = math.exp %77 : vector<8x128xf32>
    %cst_22 = arith.constant 1.000000e+00 : f32
    %79 = vector.broadcast %cst_22 : f32 to vector<8x128xf32>
    %80 = arith.addf %79, %78 : vector<8x128xf32>
    %81 = tpu.reciprocal %80 {approx = true} : vector<8x128xf32> -> vector<8x128xf32>
    %cst_23 = arith.constant 0.000000e+00 : f32
    %82 = vector.broadcast %cst_23 : f32 to vector<8x128xf32>
    %83 = arith.cmpf oge, %74, %82 : vector<8x128xf32>
    %cst_24 = arith.constant 1.000000e+00 : f32
    %84 = vector.broadcast %cst_24 : f32 to vector<8x128xf32>
    %85 = arith.subf %84, %81 : vector<8x128xf32>
    %86 = arith.select %83, %81, %85 : vector<8x128xi1>, vector<8x128xf32>
    %87 = arith.mulf %86, %10 : vector<8x128xf32>
    %cst_25 = arith.constant 1.000000e+00 : f32
    %88 = vector.broadcast %cst_25 : f32 to vector<8x128xf32>
    %89 = arith.subf %88, %86 : vector<8x128xf32>
    %90 = arith.mulf %89, %11 : vector<8x128xf32>
    %91 = arith.addf %87, %90 : vector<8x128xf32>
    %92 = tpu.concatenate %69, %91 in 1 : vector<8x128xf32>, vector<8x128xf32> -> vector<8x256xf32>
    %93 = arith.truncf %92 : vector<8x256xf32> to vector<8x256xbf16>
    %c0_26 = arith.constant 0 : index
    %c0_27 = arith.constant 0 : index
    %94 = vector.load %arg6[%c0_26, %c0_27] : memref<256x32xbf16, #tpu.memory_space<vmem>>, vector<256x32xbf16>
    %cst_28 = arith.constant dense<0.000000e+00> : vector<8x32xf32>
    %95 = tpu.matmul %93, %94, %cst_28 {dimension_numbers = #tpu.dot_dimension_numbers<[1], [0], [0], [1], [0, 0, 1, 1], [], []>} : vector<8x256xbf16>, vector<256x32xbf16>, vector<8x32xf32> -> vector<8x32xf32>
    %c0_29 = arith.constant 0 : index
    %c0_30 = arith.constant 0 : index
    %96 = vector.load %arg7[%c0_29, %c0_30] : memref<1x32xf32, #tpu.memory_space<vmem>>, vector<1x32xf32>
    %97 = vector.broadcast %96 : vector<1x32xf32> to vector<8x32xf32>
    %98 = arith.addf %95, %97 : vector<8x32xf32>
    %cst_31 = arith.constant 0.000000e+00 : f32
    %99 = vector.broadcast %cst_31 : f32 to vector<8x32xf32>
    %100 = arith.maximumf %98, %99 : vector<8x32xf32>
    %101 = arith.truncf %100 : vector<8x32xf32> to vector<8x32xbf16>
    %c0_32 = arith.constant 0 : index
    %c0_33 = arith.constant 0 : index
    %102 = vector.load %arg8[%c0_32, %c0_33] : memref<32x32xbf16, #tpu.memory_space<vmem>>, vector<32x32xbf16>
    %cst_34 = arith.constant dense<0.000000e+00> : vector<8x32xf32>
    %103 = tpu.matmul %101, %102, %cst_34 {dimension_numbers = #tpu.dot_dimension_numbers<[1], [0], [0], [1], [0, 0, 1, 1], [], []>} : vector<8x32xbf16>, vector<32x32xbf16>, vector<8x32xf32> -> vector<8x32xf32>
    %c0_35 = arith.constant 0 : index
    %c0_36 = arith.constant 0 : index
    %104 = vector.load %arg9[%c0_35, %c0_36] : memref<1x32xf32, #tpu.memory_space<vmem>>, vector<1x32xf32>
    %105 = vector.broadcast %104 : vector<1x32xf32> to vector<8x32xf32>
    %106 = arith.addf %103, %105 : vector<8x32xf32>
    %cst_37 = arith.constant 0.000000e+00 : f32
    %107 = vector.broadcast %cst_37 : f32 to vector<8x32xf32>
    %108 = arith.maximumf %106, %107 : vector<8x32xf32>
    %109 = arith.truncf %108 : vector<8x32xf32> to vector<8x32xbf16>
    %c0_38 = arith.constant 0 : index
    %c0_39 = arith.constant 0 : index
    %110 = vector.load %arg10[%c0_38, %c0_39] : memref<32x256xbf16, #tpu.memory_space<vmem>>, vector<32x256xbf16>
    %cst_40 = arith.constant dense<0.000000e+00> : vector<8x256xf32>
    %111 = tpu.matmul %109, %110, %cst_40 {dimension_numbers = #tpu.dot_dimension_numbers<[1], [0], [0], [1], [0, 0, 1, 1], [], []>} : vector<8x32xbf16>, vector<32x256xbf16>, vector<8x256xf32> -> vector<8x256xf32>
    %c0_41 = arith.constant 0 : index
    %c0_42 = arith.constant 0 : index
    %112 = vector.load %arg11[%c0_41, %c0_42] : memref<1x256xf32, #tpu.memory_space<vmem>>, vector<1x256xf32>
    %113 = vector.broadcast %112 : vector<1x256xf32> to vector<8x256xf32>
    %114 = arith.addf %111, %113 : vector<8x256xf32>
    %cst_43 = arith.constant 0.000000e+00 : f32
    %115 = vector.broadcast %cst_43 : f32 to vector<8x256xf32>
    %116 = arith.maximumf %114, %115 : vector<8x256xf32>
    %117 = arith.truncf %116 : vector<8x256xf32> to vector<8x256xbf16>
    %c0_44 = arith.constant 0 : index
    %c0_45 = arith.constant 0 : index
    %118 = vector.load %arg12[%c0_44, %c0_45] : memref<256x256xbf16, #tpu.memory_space<vmem>>, vector<256x256xbf16>
    %cst_46 = arith.constant dense<0.000000e+00> : vector<8x256xf32>
    %119 = tpu.matmul %117, %118, %cst_46 {dimension_numbers = #tpu.dot_dimension_numbers<[1], [0], [0], [1], [0, 0, 1, 1], [], []>} : vector<8x256xbf16>, vector<256x256xbf16>, vector<8x256xf32> -> vector<8x256xf32>
    %c0_47 = arith.constant 0 : index
    %c0_48 = arith.constant 0 : index
    %120 = vector.load %arg13[%c0_47, %c0_48] : memref<1x256xf32, #tpu.memory_space<vmem>>, vector<1x256xf32>
    %121 = vector.broadcast %120 : vector<1x256xf32> to vector<8x256xf32>
    %122 = arith.addf %119, %121 : vector<8x256xf32>
    %cst_49 = arith.constant 0.000000e+00 : f32
    %123 = vector.broadcast %cst_49 : f32 to vector<8x256xf32>
    %124 = arith.maximumf %122, %123 : vector<8x256xf32>
    %125 = arith.truncf %124 : vector<8x256xf32> to vector<8x256xbf16>
    %c0_50 = arith.constant 0 : index
    %c0_51 = arith.constant 0 : index
    %126 = vector.load %arg14[%c0_50, %c0_51] : memref<256x128xbf16, #tpu.memory_space<vmem>>, vector<256x128xbf16>
    %cst_52 = arith.constant dense<0.000000e+00> : vector<8x128xf32>
    %127 = tpu.matmul %125, %126, %cst_52 {dimension_numbers = #tpu.dot_dimension_numbers<[1], [0], [0], [1], [0, 0, 1, 1], [], []>} : vector<8x256xbf16>, vector<256x128xbf16>, vector<8x128xf32> -> vector<8x128xf32>
    %c0_53 = arith.constant 0 : index
    %c0_54 = arith.constant 0 : index
    %128 = vector.load %arg15[%c0_53, %c0_54] : memref<1x128xf32, #tpu.memory_space<vmem>>, vector<1x128xf32>
    %129 = vector.broadcast %128 : vector<1x128xf32> to vector<8x128xf32>
    %130 = arith.addf %127, %129 : vector<8x128xf32>
    %c0_55 = arith.constant 0 : index
    %c0_56 = arith.constant 0 : index
    %131 = vector.load %arg16[%c0_55, %c0_56] : memref<8x128xf32, #tpu.memory_space<vmem>>, vector<8x128xf32>
    tpu.vector_store %arg16[%c0_55, %c0_56], %130 {strides = array<i32>} : memref<8x128xf32, #tpu.memory_space<vmem>>, vector<8x128xf32>,
    return
  }
  func.func @transform_0(%arg0: i32) -> (i32, i32) {
    %c0_i32 = arith.constant 0 : i32
    %c0_i32_0 = arith.constant 0 : i32
    return %arg0, %c0_i32 : i32, i32
  }
  func.func @transform_1(%arg0: i32) -> (i32, i32) {
    %c0_i32 = arith.constant 0 : i32
    %c0_i32_0 = arith.constant 0 : i32
    %c0_i32_1 = arith.constant 0 : i32
    return %c0_i32, %c0_i32_0 : i32, i32
  }
  func.func @transform_2(%arg0: i32) -> (i32, i32) {
    %c0_i32 = arith.constant 0 : i32
    %c0_i32_0 = arith.constant 0 : i32
    %c0_i32_1 = arith.constant 0 : i32
    return %c0_i32, %c0_i32_0 : i32, i32
  }
  func.func @transform_3(%arg0: i32) -> (i32, i32) {
    %c0_i32 = arith.constant 0 : i32
    %c0_i32_0 = arith.constant 0 : i32
    %c0_i32_1 = arith.constant 0 : i32
    return %c0_i32, %c0_i32_0 : i32, i32
  }
  func.func @transform_4(%arg0: i32) -> (i32, i32) {
    %c0_i32 = arith.constant 0 : i32
    %c0_i32_0 = arith.constant 0 : i32
    %c0_i32_1 = arith.constant 0 : i32
    return %c0_i32, %c0_i32_0 : i32, i32
  }
  func.func @transform_5(%arg0: i32) -> (i32, i32) {
    %c0_i32 = arith.constant 0 : i32
    %c0_i32_0 = arith.constant 0 : i32
    %c0_i32_1 = arith.constant 0 : i32
    return %c0_i32, %c0_i32_0 : i32, i32
  }
  func.func @transform_6(%arg0: i32) -> (i32, i32) {
    %c0_i32 = arith.constant 0 : i32
    %c0_i32_0 = arith.constant 0 : i32
    %c0_i32_1 = arith.constant 0 : i32
    return %c0_i32, %c0_i32_0 : i32, i32
  }
  func.func @transform_7(%arg0: i32) -> (i32, i32) {
    %c0_i32 = arith.constant 0 : i32
    %c0_i32_0 = arith.constant 0 : i32
    %c0_i32_1 = arith.constant 0 : i32
    return %c0_i32, %c0_i32_0 : i32, i32
  }
  func.func @transform_8(%arg0: i32) -> (i32, i32) {
    %c0_i32 = arith.constant 0 : i32
    %c0_i32_0 = arith.constant 0 : i32
    %c0_i32_1 = arith.constant 0 : i32
    return %c0_i32, %c0_i32_0 : i32, i32
  }
  func.func @transform_9(%arg0: i32) -> (i32, i32) {
    %c0_i32 = arith.constant 0 : i32
    %c0_i32_0 = arith.constant 0 : i32
    %c0_i32_1 = arith.constant 0 : i32
    return %c0_i32, %c0_i32_0 : i32, i32
  }
  func.func @transform_10(%arg0: i32) -> (i32, i32) {
    %c0_i32 = arith.constant 0 : i32
    %c0_i32_0 = arith.constant 0 : i32
    %c0_i32_1 = arith.constant 0 : i32
    return %c0_i32, %c0_i32_0 : i32, i32
  }
  func.func @transform_11(%arg0: i32) -> (i32, i32) {
    %c0_i32 = arith.constant 0 : i32
    %c0_i32_0 = arith.constant 0 : i32
    %c0_i32_1 = arith.constant 0 : i32
    return %c0_i32, %c0_i32_0 : i32, i32
  }
  func.func @transform_12(%arg0: i32) -> (i32, i32) {
    %c0_i32 = arith.constant 0 : i32
    %c0_i32_0 = arith.constant 0 : i32
    %c0_i32_1 = arith.constant 0 : i32
    return %c0_i32, %c0_i32_0 : i32, i32
  }
  func.func @transform_13(%arg0: i32) -> (i32, i32) {
    %c0_i32 = arith.constant 0 : i32
    %c0_i32_0 = arith.constant 0 : i32
    %c0_i32_1 = arith.constant 0 : i32
    return %c0_i32, %c0_i32_0 : i32, i32
  }
  func.func @transform_14(%arg0: i32) -> (i32, i32) {
    %c0_i32 = arith.constant 0 : i32
    %c0_i32_0 = arith.constant 0 : i32
    %c0_i32_1 = arith.constant 0 : i32
    return %c0_i32, %c0_i32_0 : i32, i32
  }
  func.func @transform_15(%arg0: i32) -> (i32, i32) {
    %c0_i32 = arith.constant 0 : i32
    %c0_i32_0 = arith.constant 0 : i32
    return %arg0, %c0_i32 : i32, i32
  }
}

</mosaic_0001>

<bundles_post_ra>
// kernel: gat_actor_forward.1
= control target key start
LH: loop header
LB: loop body
LE: loop exit
PB: predicated region body
PF: predicated region fallthrough
CT: control target
= control target key end

     0   :  { %20 = vsyncpa [#allocation3], 0  ;;  %s2820_s0 = inlined_call_operand.vmem [shape: f32[8,37], index: 0, kind: input, shape index: {}]   ;;  %s2821_s1 = inlined_call_operand.hbm [shape: f32[2,128], index: 1, kind: input, shape index: {}]   ;;  %s2822_s2 = inlined_call_operand.hbm [shape: bf16[37,1280], index: 2, kind: input, shape index: {}]   ;;  %s2823_s3 = inlined_call_operand.hbm [shape: f32[1,1280], index: 3, kind: input, shape index: {}]   ;;  %s2824_s4 = inlined_call_operand.hbm [shape: bf16[256,256], index: 4, kind: input, shape index: {}]   ;;  %s2825_s5 = inlined_call_operand.vmem [shape: bf16[256,32], index: 5, kind: input, shape index: {}]   ;;  %s2826_s6 = inlined_call_operand.hbm [shape: f32[1,32], index: 6, kind: input, shape index: {}]   ;;  %s2827_s7 = inlined_call_operand.vmem [shape: bf16[32,32], index: 7, kind: input, shape index: {}]   ;;  %s2828_s8 = inlined_call_operand.hbm [shape: f32[1,32], index: 8, kind: input, shape index: {}]   ;;  %s2829_s9 = inlined_call_operand.vmem [shape: bf16[32,256], index: 9, kind: input, shape index: {}]   ;;  %s2830_s10 = inlined_call_operand.hbm [shape: f32[1,256], index: 10, kind: input, shape index: {}]   ;;  %s2831_s11 = inlined_call_operand.hbm [shape: bf16[256,256], index: 11, kind: input, shape index: {}]   ;;  %s2832_s12 = inlined_call_operand.hbm [shape: f32[1,256], index: 12, kind: input, shape index: {}]   ;;  %s2833_s13 = inlined_call_operand.vmem [shape: bf16[256,128], index: 13, kind: input, shape index: {}]   ;;  %s2834_s14 = inlined_call_operand.hbm [shape: f32[1,128], index: 14, kind: input, shape index: {}]   ;;  %s2835_s15 = inlined_call_operand.vmem [shape: f32[8,128], index: 15, kind: output, shape index: {}]  }
   0x1   :  { %21 = vsyncpa [#allocation5], 0 }
   0x2   :  { %22 = vsyncpa [#allocation8], 0 }
   0x3   :  { %23 = vsyncpa [#allocation11], 0 }
   0x4   :  { %24 = vsyncpa [#allocation14], 0 }
   0x5   :  { %25 = vsyncpa [#allocation17], 0  ;;  %s2394_s18 = smov [#allocation4]   ;;  %s2162_s22 = scalar_lea.hbm %s2822_s2, 3200 }
   0x6   :  { %s43_s19 = sshll.u32 %s2394_s18, 4  ;;  %p2163_p0 = scmp.ne.s32.totalorder %s2822_s2, %s2162_s22  ;;  %s44_s19 = int_to_ptr.vmem [resolvable:$true] %s43_s19 }
   0x7   :  { %p2166_p1 = scmp.lt.u32.totalorder %s2162_s22, %s2822_s2 }
   0x9   :  { %p2168_p2 = pnand %p2166_p1, %p2163_p0 }
   0xb   :  { %2171 = shalt.err (!%p2168_p2)
}
   0xc   :  { %s2172_s27 = scalar_lea.vmem %s44_s19, 3200  ;;  %p2177_p4 = scmp.lt.s32.totalorder %s44_s19, %s44_s19 }
   0xd   :  { %p2173_p3 = scmp.ne.s32.totalorder %s44_s19, %s2172_s27  ;;  %p2178_p5 = scmp.lt.s32.totalorder %s2172_s27, %s2172_s27 }
   0xf   :  { %p2179_p6 = por %p2178_p5, %p2177_p4 }
  0x11   :  { %p2180_p7 = pnand %p2179_p6, %p2173_p3 }
  0x13   :  { %2183 = shalt.err (!%p2180_p7)
}
  0x14   :  { %s2395_s28 = smov 640   ;;  %s2396_s29 = smov 40  }
  0x15   :  { %49 = dma.hbm_to_vmem [thread:$0]  %s2822_s2, 3200, %s44_s19, [#allocation5], %s2395_s28, %s2395_s28, %s2396_s29  }
  0x16   :  { %s2397_s17 = smov [#allocation7]   ;;  %s2184_s22 = scalar_lea.hbm %s2824_s4, 4096 }
  0x17   :  { %s65_s18 = sshll.u32 %s2397_s17, 4  ;;  %p2185_p8 = scmp.ne.s32.totalorder %s2824_s4, %s2184_s22  ;;  %s66_s18 = int_to_ptr.vmem [resolvable:$true] %s65_s18 }
  0x18   :  { %p2188_p9 = scmp.lt.u32.totalorder %s2184_s22, %s2824_s4 }
  0x1a   :  { %p2190_p10 = pnand %p2188_p9, %p2185_p8 }
  0x1c   :  { %2193 = shalt.err (!%p2190_p10)
}
  0x1d   :  { %s2194_s27 = scalar_lea.vmem %s66_s18, 4096  ;;  %p2199_p12 = scmp.lt.s32.totalorder %s66_s18, %s66_s18 }
  0x1e   :  { %p2195_p11 = scmp.ne.s32.totalorder %s66_s18, %s2194_s27  ;;  %p2200_p13 = scmp.lt.s32.totalorder %s2194_s27, %s2194_s27 }
  0x20   :  { %p2201_p0 = por %p2200_p13, %p2199_p12 }
  0x22   :  { %p2202_p1 = pnand %p2201_p0, %p2195_p11 }
  0x24   :  { %2205 = shalt.err (!%p2202_p1)
}
  0x25   :  { %s2398_s2 = smov 128   ;;  %s2399_s19 = smov 8  }
  0x26   :  { %71 = dma.hbm_to_vmem [thread:$0]  %s2824_s4, 4096, %s66_s18, [#allocation8], %s2398_s2, %s2398_s2, %s2399_s19  }
  0x27   :  { %s2400_s30 = smov [#allocation10]   ;;  %s2401_s17 = smov [#allocation13]  }
  0x28   :  { %s92_s16 = sshll.u32 %s2400_s30, 4  ;;  %s113_s20 = sshll.u32 %s2401_s17, 4  ;;  %s93_s16 = int_to_ptr.vmem [resolvable:$true] %s92_s16  ;;  %s2523_s20 = int_to_ptr.vmem [resolvable:$true] %s113_s20 }
  0x29   :  { %s2206_s23 = scalar_lea.hbm %s2828_s8, 16 }
  0x2a   :  { %p2207_p2 = scmp.ne.s32.totalorder %s2828_s8, %s2206_s23  ;;  %p2210_p3 = scmp.lt.u32.totalorder %s2206_s23, %s2828_s8 }
  0x2c   :  { %p2212_p4 = pnand %p2210_p3, %p2207_p2 }
  0x2e   :  { %2215 = shalt.err (!%p2212_p4)
}
  0x2f   :  { %s2216_s4 = scalar_lea.vmem %s93_s16, 16  ;;  %s2220_s18 = scalar_lea.vmem %s93_s16, 32 }
  0x30   :  { %p2217_p5 = scmp.ne.s32.totalorder %s93_s16, %s2216_s4  ;;  %p2221_p6 = scmp.lt.s32.totalorder %s93_s16, %s93_s16 }
  0x31   :  { %p2222_p7 = scmp.lt.s32.totalorder %s2220_s18, %s2216_s4 }
  0x33   :  { %p2223_p8 = por %p2222_p7, %p2221_p6 }
  0x35   :  { %p2224_p9 = pnand %p2223_p8, %p2217_p5 }
  0x37   :  { %2227 = shalt.err (!%p2224_p9)
}
  0x38   :  { %95 = dma.hbm_to_vmem [thread:$0]  %s2828_s8, 16, %s93_s16, [#allocation11]  }
  0x39   :  { %s2228_s21 = scalar_lea.hbm %s2831_s11, 4096 }
  0x3a   :  { %p2229_p10 = scmp.ne.s32.totalorder %s2831_s11, %s2228_s21  ;;  %p2232_p11 = scmp.lt.u32.totalorder %s2228_s21, %s2831_s11 }
  0x3c   :  { %p2234_p12 = pnand %p2232_p11, %p2229_p10 }
  0x3e   :  { %2237 = shalt.err (!%p2234_p12)
}
  0x3f   :  { %s2238_s26 = scalar_lea.vmem %s2523_s20, 4096  ;;  %p2243_p0 = scmp.lt.s32.totalorder %s2523_s20, %s2523_s20 }
  0x40   :  { %p2239_p13 = scmp.ne.s32.totalorder %s2523_s20, %s2238_s26  ;;  %p2244_p1 = scmp.lt.s32.totalorder %s2238_s26, %s2238_s26 }
  0x42   :  { %p2245_p2 = por %p2244_p1, %p2243_p0 }
  0x44   :  { %p2246_p3 = pnand %p2245_p2, %p2239_p13 }
  0x46   :  { %2249 = shalt.err (!%p2246_p3)
}
  0x47   :  { %119 = dma.hbm_to_vmem [thread:$0]  %s2831_s11, 4096, %s2523_s20, [#allocation14], %s2398_s2, %s2398_s2, %s2399_s19  }
  0x48   :  { %s2402_s27 = smov [#allocation2]   ;;  %s2403_s18 = smov [#allocation6]  }
  0x49   :  { %s34_s4 = sshll.u32 %s2402_s27, 4  ;;  %s56_s28 = sshll.u32 %s2403_s18, 4  ;;  %s35_s4 = int_to_ptr.vmem [resolvable:$true] %s34_s4  ;;  %s57_s28 = int_to_ptr.vmem [resolvable:$true] %s56_s28 }
  0x4a   :  { %s2250_s17 = scalar_lea.hbm %s2821_s1, 32 }
  0x4b   :  { %p2251_p4 = scmp.ne.s32.totalorder %s2821_s1, %s2250_s17  ;;  %p2254_p5 = scmp.lt.u32.totalorder %s2250_s17, %s2821_s1 }
  0x4d   :  { %p2256_p6 = pnand %p2254_p5, %p2251_p4 }
  0x4f   :  { %2259 = shalt.err (!%p2256_p6)
}
  0x50   :  { %s2260_s11 = scalar_lea.vmem %s35_s4, 32  ;;  %p2265_p8 = scmp.lt.s32.totalorder %s35_s4, %s35_s4 }
  0x51   :  { %p2261_p7 = scmp.ne.s32.totalorder %s35_s4, %s2260_s11  ;;  %p2266_p9 = scmp.lt.s32.totalorder %s2260_s11, %s2260_s11 }
  0x53   :  { %p2267_p10 = por %p2266_p9, %p2265_p8 }
  0x55   :  { %p2268_p11 = pnand %p2267_p10, %p2261_p7 }
  0x57   :  { %2271 = shalt.err (!%p2268_p11)
}
  0x58   :  { %37 = dma.hbm_to_vmem [thread:$0]  %s2821_s1, 32, %s35_s4, [#allocation3]  }
  0x59   :  { %s2272_s26 = scalar_lea.hbm %s2823_s3, 160 }
  0x5a   :  { %p2273_p12 = scmp.ne.s32.totalorder %s2823_s3, %s2272_s26  ;;  %p2276_p13 = scmp.lt.u32.totalorder %s2272_s26, %s2823_s3 }
  0x5c   :  { %p2278_p0 = pnand %p2276_p13, %p2273_p12 }
  0x5e   :  { %2281 = shalt.err (!%p2278_p0)
}
  0x5f   :  { %s2282_s29 = scalar_lea.vmem %s57_s28, 160  ;;  %p2287_p2 = scmp.lt.s32.totalorder %s57_s28, %s57_s28 }
  0x60   :  { %p2283_p1 = scmp.ne.s32.totalorder %s57_s28, %s2282_s29  ;;  %p2288_p3 = scmp.lt.s32.totalorder %s2282_s29, %s2282_s29 }
  0x62   :  { %p2289_p4 = por %p2288_p3, %p2287_p2 }
  0x64   :  { %p2290_p5 = pnand %p2289_p4, %p2283_p1 }
  0x66   :  { %2293 = shalt.err (!%p2290_p5)
}
  0x67   :  { %59 = dma.hbm_to_vmem [thread:$0]  %s2823_s3, 160, %s57_s28, [#allocation5]  }
  0x68   :  { %s2404_s30 = smov [#allocation9]   ;;  %s2405_s21 = smov [#allocation12]  }
  0x69   :  { %s80_s17 = sshll.u32 %s2404_s30, 4  ;;  %s104_s22 = sshll.u32 %s2405_s21, 4  ;;  %s81_s17 = int_to_ptr.vmem [resolvable:$true] %s80_s17  ;;  %s105_s22 = int_to_ptr.vmem [resolvable:$true] %s104_s22 }
  0x6a   :  { %s2294_s11 = scalar_lea.hbm %s2826_s6, 16 }
  0x6b   :  { %p2295_p6 = scmp.ne.s32.totalorder %s2826_s6, %s2294_s11  ;;  %p2298_p7 = scmp.lt.u32.totalorder %s2294_s11, %s2826_s6 }
  0x6d   :  { %p2300_p8 = pnand %p2298_p7, %p2295_p6 }
  0x6f   :  { %2303 = shalt.err (!%p2300_p8)
}
  0x70   :  { %s2304_s3 = scalar_lea.vmem %s81_s17, 16  ;;  %s2308_s28 = scalar_lea.vmem %s81_s17, 32 }
  0x71   :  { %p2305_p9 = scmp.ne.s32.totalorder %s81_s17, %s2304_s3  ;;  %p2309_p10 = scmp.lt.s32.totalorder %s81_s17, %s81_s17 }
  0x72   :  { %p2310_p11 = scmp.lt.s32.totalorder %s2308_s28, %s2304_s3 }
  0x74   :  { %p2311_p12 = por %p2310_p11, %p2309_p10 }
  0x76   :  { %p2312_p13 = pnand %p2311_p12, %p2305_p9 }
  0x78   :  { %2315 = shalt.err (!%p2312_p13)
}
  0x79   :  { %83 = dma.hbm_to_vmem [thread:$0]  %s2826_s6, 16, %s81_s17, [#allocation8]  }
  0x7a   :  { %s2316_s18 = scalar_lea.hbm %s2830_s10, 32 }
  0x7b   :  { %p2317_p0 = scmp.ne.s32.totalorder %s2830_s10, %s2316_s18  ;;  %p2320_p1 = scmp.lt.u32.totalorder %s2316_s18, %s2830_s10 }
  0x7d   :  { %p2322_p2 = pnand %p2320_p1, %p2317_p0 }
  0x7f   :  { %2325 = shalt.err (!%p2322_p2)
}
  0x80   :  { %s2326_s21 = scalar_lea.vmem %s105_s22, 32  ;;  %p2331_p4 = scmp.lt.s32.totalorder %s105_s22, %s105_s22 }
  0x81   :  { %p2327_p3 = scmp.ne.s32.totalorder %s105_s22, %s2326_s21  ;;  %p2332_p5 = scmp.lt.s32.totalorder %s2326_s21, %s2326_s21 }
  0x83   :  { %p2333_p6 = por %p2332_p5, %p2331_p4 }
  0x85   :  { %p2334_p7 = pnand %p2333_p6, %p2327_p3 }
  0x87   :  { %2337 = shalt.err (!%p2334_p7)
}
  0x88   :  { %107 = dma.hbm_to_vmem [thread:$0]  %s2830_s10, 32, %s105_s22, [#allocation11]  }
  0x89   :  { %s2406_s23 = smov [#allocation15]   ;;  %s2407_s11 = smov [#allocation16]  }
  0x8a   :  { %s126_s24 = sshll.u32 %s2406_s23, 4  ;;  %s138_s2 = sshll.u32 %s2407_s11, 4  ;;  %s127_s24 = int_to_ptr.vmem [resolvable:$true] %s126_s24  ;;  %s139_s2 = int_to_ptr.vmem [resolvable:$true] %s138_s2 }
  0x8b   :  { %s2338_s25 = scalar_lea.hbm %s2832_s12, 32 }
  0x8c   :  { %p2339_p8 = scmp.ne.s32.totalorder %s2832_s12, %s2338_s25  ;;  %p2342_p9 = scmp.lt.u32.totalorder %s2338_s25, %s2832_s12 }
  0x8e   :  { %p2344_p10 = pnand %p2342_p9, %p2339_p8 }
  0x90   :  { %2347 = shalt.err (!%p2344_p10)
}
  0x91   :  { %s2348_s10 = scalar_lea.vmem %s127_s24, 32  ;;  %p2353_p12 = scmp.lt.s32.totalorder %s127_s24, %s127_s24 }
  0x92   :  { %p2349_p11 = scmp.ne.s32.totalorder %s127_s24, %s2348_s10  ;;  %p2354_p13 = scmp.lt.s32.totalorder %s2348_s10, %s2348_s10 }
  0x94   :  { %p2355_p0 = por %p2354_p13, %p2353_p12 }
  0x96   :  { %p2356_p1 = pnand %p2355_p0, %p2349_p11 }
  0x98   :  { %2359 = shalt.err (!%p2356_p1)
}
  0x99   :  { %129 = dma.hbm_to_vmem [thread:$0]  %s2832_s12, 32, %s127_s24, [#allocation14]  }
  0x9a   :  { %s2360_s29 = scalar_lea.hbm %s2834_s14, 16 }
  0x9b   :  { %p2361_p2 = scmp.ne.s32.totalorder %s2834_s14, %s2360_s29  ;;  %p2364_p3 = scmp.lt.u32.totalorder %s2360_s29, %s2834_s14 }
  0x9d   :  { %p2366_p4 = pnand %p2364_p3, %p2361_p2 }
  0x9f   :  { %2369 = shalt.err (!%p2366_p4)
}
  0xa0   :  { %s2370_s6 = scalar_lea.vmem %s139_s2, 16  ;;  %s2374_s17 = scalar_lea.vmem %s139_s2, 32 }
  0xa1   :  { %p2371_p5 = scmp.ne.s32.totalorder %s139_s2, %s2370_s6  ;;  %p2375_p6 = scmp.lt.s32.totalorder %s139_s2, %s139_s2 }
  0xa2   :  { %p2376_p7 = scmp.lt.s32.totalorder %s2374_s17, %s2370_s6 }
  0xa4   :  { %p2377_p8 = por %p2376_p7, %p2375_p6 }
  0xa6   :  { %p2378_p9 = pnand %p2377_p8, %p2371_p5 }
  0xa8   :  { %2381 = shalt.err (!%p2378_p9)
}
  0xa9   :  { %141 = dma.hbm_to_vmem [thread:$0]  %s2834_s14, 16, %s139_s2, [#allocation17]  }
  0xaa   :  { %2382 = dma.done.wait [#allocation3], 32  }
  0xab   :  { %2383 = vsyncadd [#allocation3], 4294967264 }
  0xac   :  { %2384 = dma.done.wait [#allocation5], 3360  }
  0xad   :  { %2385 = vsyncadd [#allocation5], 4294963936 }
  0xae   :  { %2386 = dma.done.wait [#allocation8], 4112  }
  0xaf   :  { %2387 = vsyncadd [#allocation8], 4294963184 }
  0xb0   :  { %2388 = dma.done.wait [#allocation11], 48  }
  0xb1   :  { %2389 = vsyncadd [#allocation11], 4294967248 }
  0xb2   :  { %2390 = dma.done.wait [#allocation14], 4128  }
  0xb3   :  { %2391 = vsyncadd [#allocation14], 4294963168 }
  0xb4   :  { %2392 = dma.done.wait [#allocation17], 16  }
  0xb5   :  { %2393 = vsyncadd [#allocation17], 4294967280  ;;  %v2408_v0 = vmov 0   ;;  %vm383_vm0 = vcmask 1041408   ;;  %v1974_v1 = vld [vmem:[#allocation4 + $0x14] ss:$40 sps:$4 sm:$0xff]  }
  0xb6   :  { %531 = vmatprep.mubr.bf16.mxu0 %v2408_v0  ;;  %449 = vmatprep.mubr.bf16.mxu1 %v2408_v0  ;;  %v1976_v2 = vld [vmem:[#allocation4 + $0x4] ss:$40 sps:$4 sm:$0xff]   ;;  %vm384_vm1 = vcmask 1042432   ;;  %v2409_v3 = vmov 65535   ;;  %v1978_v5 = vld [vmem:[#allocation4 + $0x10] ss:$40 sps:$4 sm:$0xff]  }
  0xb7   :  { %v385_v4 = vsel %vm383_vm0, 4294967295, %v2409_v3  ;;  %499 = vmatprep.subr.bf16.mxu0 %v1974_v1  ;;  %v1979_v6 = vld [vmem:[#allocation4] ss:$40 sps:$4 sm:$0xff]   ;;  %417 = vmatprep.subr.bf16.mxu1 %v1976_v2  ;;  %v1980_v7 = vld [vmem:[#allocation4 + $0x64] ss:$40 sps:$4 sm:$0xff]   ;;  %vm379_vm2 = vcmask 302080  }
  0xb8   :  { %500 = vmatpush1.bf16.msra.mxu0 %v1978_v5  ;;  %418 = vmatpush1.bf16.msra.mxu1 %v1979_v6  ;;  %v1982_v8 = vld [vmem:[#allocation4 + $0x54] ss:$40 sps:$4 sm:$0xff]   ;;  %v1984_v9 = vld [vmem:[#allocation4 + $0x60] ss:$40 sps:$4 sm:$0xff]   ;;  %v2631_v10 = vsel %vm384_vm1, %v385_v4, 0  ;;  %vm2415_vm7 = vmmov 0  }
  0xb9   :  { %501 = vmatprep.subr.bf16.mxu0 %v1980_v7  ;;  %v1985_v11 = vld [vmem:[#allocation4 + $0x50] ss:$40 sps:$4 sm:$0xff]   ;;  %v195_v13 = vld [vmem:[#allocation4 + $0xa0] sm:$0x77]  ;;  %419 = vmatprep.subr.bf16.mxu1 %v1982_v8  ;;  %v2000_v26 = vld [vmem:[#allocation4 + $0xc] ss:$40 sps:$4 sm:$0xff]  }
  0xba   :  { %v197_v12 = vld [vmem:[#allocation4 + $0xb0] sm:$0x77]  ;;  %v1770_v15 = vcombine.high %v195_v13, %v195_v13  ;;  %v1769_v17 = vcombine.low %v195_v13, %v195_v13  ;;  %v173_v21 = vld [vmem:[%s2820_s0] sm:$0xff]  ;;  %v196_v31 = vld [vmem:[#allocation4 + $0xa8] sm:$0x77]  ;;  %s2410_s0 = smov 124  }
  0xbb   :  { %v1774_v14 = vcombine.high %v197_v12, %v197_v12  ;;  %v1773_v16 = vcombine.low %v197_v12, %v197_v12  ;;  %v1992_v23 = vld [vmem:[#allocation4 + $0x24] ss:$40 sps:$4 sm:$0xff]   ;;  %v1990_v24 = vld [vmem:[#allocation4 + $0x20] ss:$40 sps:$4 sm:$0xff]   ;;  %v174_v27 = vpack.c.bf16 %v173_v21, %v173_v21  ;;  %v1995_v28 = vld [vmem:[#allocation4 + $0x74] ss:$40 sps:$4 sm:$0xff]   ;;  %v1772_v34 = vcombine.high %v196_v31, %v196_v31 }
  0xbc   :  { %502 = vmatpush1.bf16.msra.mxu0 %v1984_v9  ;;  %420 = vmatpush1.bf16.msra.mxu1 %v1985_v11  ;;  %v391_v19 = vand.u32 %v1770_v15, %v2631_v10  ;;  %v388_v22 = vand.u32 %v1769_v17, %v2631_v10  ;;  %v199_v25 = vld [vmem:[#allocation4 + $0xc0] sm:$0x77]  ;;  %v1998_v29 = vld [vmem:[#allocation4 + $0x8] ss:$40 sps:$4 sm:$0xff]   ;;  %v1771_v38 = vcombine.low %v196_v31, %v196_v31  ;;  %v2011_v45 = vld [vmem:[#allocation4 + $0x6c] ss:$40 sps:$4 sm:$0xff]  }
  0xbd   :  { %v403_v18 = vand.u32 %v1774_v14, %v2631_v10  ;;  %v400_v20 = vand.u32 %v1773_v16, %v2631_v10  ;;  %v2003_v30 = vld [vmem:[#allocation4 + $0x5c] ss:$40 sps:$4 sm:$0xff]   ;;  %v1778_v32 = vcombine.high %v199_v25, %v199_v25  ;;  %v1993_v33 = vld [vmem:[#allocation4 + $0x70] ss:$40 sps:$4 sm:$0xff]   ;;  %v1777_v36 = vcombine.low %v199_v25, %v199_v25 }
  0xbe   :  { %421 = vmatprep.subr.bf16.mxu1 %v391_v19  ;;  %v2001_v35 = vld [vmem:[#allocation4 + $0x58] ss:$40 sps:$4 sm:$0xff]   ;;  %v397_v39 = vand.u32 %v1772_v34, %v2631_v10  ;;  %v394_v41 = vand.u32 %v1771_v38, %v2631_v10  ;;  %v2008_v42 = vld [vmem:[#allocation4 + $0x1c] ss:$40 sps:$4 sm:$0xff]   ;;  %v2009_v44 = vld [vmem:[#allocation4 + $0x68] ss:$40 sps:$4 sm:$0xff]  }
  0xbf   :  { %503 = vmatprep.subr.bf16.mxu0 %v403_v18  ;;  %v415_v37 = vand.u32 %v1778_v32, %v2631_v10  ;;  %v412_v40 = vand.u32 %v1777_v36, %v2631_v10  ;;  %v2006_v43 = vld [vmem:[#allocation4 + $0x18] ss:$40 sps:$4 sm:$0xff]   ;;  %v2019_v54 = vld [vmem:[#allocation7 + $0x14] ss:$8 sps:$4 sm:$0xff]   ;;  %vm1184_vm8 = vcmask 261120  }
  0xc0   :  { %504 = vmatpush1.bf16.msra.mxu0 %v400_v20  ;;  %422 = vmatpush1.bf16.msra.mxu1 %v388_v22  ;;  %v198_v46 = vld [vmem:[#allocation4 + $0xb8] sm:$0x77]  ;;  %v2017_v53 = vld [vmem:[#allocation7 + $0x10] ss:$8 sps:$4 sm:$0xff]   ;;  %v2025_v57 = vld [vmem:[#allocation7 + $0x34] ss:$8 sps:$4 sm:$0xff]   ;;  %v204_v20 = vlaneseq }
  0xc1   :  { %581 = vmatprep.subr.bf16.mxu0 %v1992_v23  ;;  %458 = vmatprep.subr.bf16.mxu1 %v2000_v26  ;;  %v1776_v47 = vcombine.high %v198_v46, %v198_v46  ;;  %v1775_v48 = vcombine.low %v198_v46, %v198_v46  ;;  %v2016_v51 = vld [vmem:[#allocation7 + $0x4] ss:$8 sps:$4 sm:$0xff]   ;;  %v2014_v52 = vld [vmem:[#allocation7] ss:$8 sps:$4 sm:$0xff]   ;;  %v2023_v58 = vld [vmem:[#allocation7 + $0x30] ss:$8 sps:$4 sm:$0xff]  }
  0xc2   :  { %v2022_v55 = vld [vmem:[#allocation7 + $0x24] ss:$8 sps:$4 sm:$0xff]   ;;  %v2020_v56 = vld [vmem:[#allocation7 + $0x20] ss:$8 sps:$4 sm:$0xff]   ;;  %v2031_v61 = vld [vmem:[#allocation7 + $0x54] ss:$8 sps:$4 sm:$0xff]  }
  0xc3   :  { %1781 = vmatmul.mubr.msk.bf16.vlgmr.msra.gmra.mrb[0].mxu0 %vm379_vm2, %v174_v27  ;;  %1779 = vmatmul.mubr.msk.bf16.vlgmr.msra.gmra.mrb[0].mxu1 %vm379_vm2, %v174_v27  ;;  %v409_v49 = vand.u32 %v1776_v47, %v2631_v10  ;;  %v406_v50 = vand.u32 %v1775_v48, %v2631_v10  ;;  %v2028_v59 = vld [vmem:[#allocation7 + $0x44] ss:$8 sps:$4 sm:$0xff]   ;;  %v2026_v60 = vld [vmem:[#allocation7 + $0x40] ss:$8 sps:$4 sm:$0xff]   ;;  %v2029_v62 = vld [vmem:[#allocation7 + $0x50] ss:$8 sps:$4 sm:$0xff]  }
  0xc4   :  { %582 = vmatpush1.bf16.msra.mxu0 %v1990_v24  ;;  %613 = vmatprep.mubr.bf16.mxu0 %v2408_v0  ;;  %v2034_v63 = vld [vmem:[#allocation7 + $0x64] ss:$8 sps:$4 sm:$0xff]   ;;  %v2032_v1 = vld [vmem:[#allocation7 + $0x60] ss:$8 sps:$4 sm:$0xff]   ;;  %v2037_v2 = vld [vmem:[#allocation7 + $0x74] ss:$8 sps:$4 sm:$0xff]  }
  0xc5   :  { %583 = vmatprep.subr.bf16.mxu0 %v1995_v28  ;;  %459 = vmatpush1.bf16.msra.mxu1 %v1998_v29  ;;  %v2035_v3 = vld [vmem:[#allocation7 + $0x70] ss:$8 sps:$4 sm:$0xff]   ;;  %v2040_v4 = vld [vmem:[#allocation7 + $0x84] ss:$8 sps:$4 sm:$0xff]   ;;  %v2038_v5 = vld [vmem:[#allocation7 + $0x80] ss:$8 sps:$4 sm:$0xff]  }
  0xc6   :  { %460 = vmatprep.subr.bf16.mxu1 %v2003_v30  ;;  %490 = vmatprep.mubr.bf16.mxu1 %v2408_v0  ;;  %v2043_v6 = vld [vmem:[#allocation7 + $0x94] ss:$8 sps:$4 sm:$0xff]   ;;  %v2041_v7 = vld [vmem:[#allocation7 + $0x90] ss:$8 sps:$4 sm:$0xff]   ;;  %v2046_v8 = vld [vmem:[#allocation7 + $0xa4] ss:$8 sps:$4 sm:$0xff]  }
  0xc7   :  { %v2044_v9 = vld [vmem:[#allocation7 + $0xa0] ss:$8 sps:$4 sm:$0xff]   ;;  %v2049_v10 = vld [vmem:[#allocation7 + $0xb4] ss:$8 sps:$4 sm:$0xff]   ;;  %v2047_v11 = vld [vmem:[#allocation7 + $0xb0] ss:$8 sps:$4 sm:$0xff]  }
  0xc8   :  { %584 = vmatpush1.bf16.msra.mxu0 %v1993_v33  ;;  %v2052_v12 = vld [vmem:[#allocation7 + $0xc4] ss:$8 sps:$4 sm:$0xff]   ;;  %v2050_v13 = vld [vmem:[#allocation7 + $0xc0] ss:$8 sps:$4 sm:$0xff]   ;;  %v2055_v14 = vld [vmem:[#allocation7 + $0xd4] ss:$8 sps:$4 sm:$0xff]  }
  0xc9   :  { %585 = vmatprep.subr.bf16.mxu0 %v415_v37  ;;  %461 = vmatpush1.bf16.msra.mxu1 %v2001_v35  ;;  %v2053_v15 = vld [vmem:[#allocation7 + $0xd0] ss:$8 sps:$4 sm:$0xff]   ;;  %v2058_v16 = vld [vmem:[#allocation7 + $0xe4] ss:$8 sps:$4 sm:$0xff]   ;;  %v2056_v17 = vld [vmem:[#allocation7 + $0xe0] ss:$8 sps:$4 sm:$0xff]  }
  0xca   :  { %462 = vmatprep.subr.bf16.mxu1 %v397_v39  ;;  %v2061_v18 = vld [vmem:[#allocation7 + $0xf4] ss:$8 sps:$4 sm:$0xff]   ;;  %v2059_v19 = vld [vmem:[#allocation7 + $0xf0] ss:$8 sps:$4 sm:$0xff]   ;;  %v2654_v21 = vshrl.u32 %v204_v20, 7 }
  0xcb   :  { %v2660_v24 = vld [vmem:[#allocation6] sm:$0xff] }
  0xcc   :  { %586 = vmatpush1.bf16.msra.mxu0 %v412_v40  ;;  %v222_v22 = vsub.s32 4, %v2654_v21  ;;  %v2658_v23 = vsub.s32 0, %v2654_v21  ;;  %v2663_v25 = vsub.s32 1, %v2654_v21 }
  0xcd   :  { %463 = vmatpush1.bf16.msra.mxu1 %v394_v41  ;;  %892 = vmatprep.subr.bf16.mxu0 %v2016_v51 }
  0xce   :  { %540 = vmatprep.subr.bf16.mxu1 %v2008_v42  ;;  %v223_v26 = vrot.slane %v2660_v24, %v222_v22  ;;  %v211_v28 = vrot.slane %v2660_v24, %v2663_v25 }
  0xcf   :  { %1783 = vmatmul.mubr.msk.bf16.vlgmr.msra.gmra.mrb[4].mxu0 %vm379_vm2, %v174_v27 }
  0xd0   :  { %1780 = vmatmul.mubr.msk.bf16.vlgmr.msra.gmra.mrb[4].mxu1 %vm379_vm2, %v174_v27  ;;  %893 = vmatpush1.bf16.msra.mxu0 %v2014_v52 }
  0xd1   :  { %572 = vmatprep.mubr.bf16.mxu1 %v2408_v0  ;;  %541 = vmatpush1.bf16.msra.mxu1 %v2006_v43  ;;  %v201_v43 = vld [vmem:[#allocation6 + $0x8] sm:$0x3] }
  0xd2   :  { %542 = vmatprep.subr.bf16.mxu1 %v2011_v45  ;;  %894 = vmatprep.subr.bf16.mxu0 %v2019_v54  ;;  %v218_v45 = vsub.s32 3, %v2654_v21  ;;  %v239_v46 = vrot.slane %v201_v43, %v2658_v23  ;;  %v243_v47 = vrot.slane %v201_v43, %v2663_v25  ;;  %v2072_v43 = vld [vmem:[%s2825_s5 + $0x68] sm:$0xff]  }
  0xd4   :  { %895 = vmatpush1.bf16.msra.mxu0 %v2017_v53 }
  0xd5   :  { %543 = vmatpush1.bf16.msra.mxu1 %v2009_v44  ;;  %896 = vmatprep.subr.bf16.mxu0 %v2022_v55  ;;  %v214_v44 = vsub.s32 2, %v2654_v21 }
  0xd6   :  { %544 = vmatprep.subr.bf16.mxu1 %v409_v49  ;;  %v219_v49 = vrot.slane %v2660_v24, %v218_v45  ;;  %v2074_v45 = vld [vmem:[%s2825_s5 + $0x70] sm:$0xff]  }
  0xd7   :  { %v215_v48 = vrot.slane %v2660_v24, %v214_v44  ;;  %v2073_v44 = vld [vmem:[%s2825_s5 + $0x28] sm:$0xff]  }
  0xd8   :  { %897 = vmatpush1.bf16.msra.mxu0 %v2020_v56 }
  0xd9   :  { %545 = vmatpush1.bf16.msra.mxu1 %v406_v50  ;;  %898 = vmatprep.subr.bf16.mxu0 %v2025_v57 }
  0xda   :  { %847 = vmatprep.subr.bf16.mxu1 %v2016_v51 }
  0xdc   :  { %1782 = vmatmul.mubr.msk.bf16.vlgmr.msra.gmra.mrb[8].mxu1 %vm379_vm2, %v174_v27  ;;  %899 = vmatpush1.bf16.msra.mxu0 %v2023_v58  ;;  %v207_v27 = vrot.slane %v2660_v24, %v2658_v23 }
  0xdd   :  { %848 = vmatpush1.bf16.msra.mxu1 %v2014_v52  ;;  %900 = vmatprep.subr.bf16.mxu0 %v2028_v59 }
  0xde   :  { %849 = vmatprep.subr.bf16.mxu1 %v2019_v54 }
  0xe0   :  { %901 = vmatpush1.bf16.msra.mxu0 %v2026_v60 }
  0xe1   :  { %850 = vmatpush1.bf16.msra.mxu1 %v2017_v53  ;;  %902 = vmatprep.subr.bf16.mxu0 %v2031_v61 }
  0xe2   :  { %851 = vmatprep.subr.bf16.mxu1 %v2022_v55 }
  0xe4   :  { %903 = vmatpush1.bf16.msra.mxu0 %v2029_v62 }
  0xe5   :  { %852 = vmatpush1.bf16.msra.mxu1 %v2020_v56  ;;  %904 = vmatprep.subr.bf16.mxu0 %v2034_v63 }
  0xe6   :  { %853 = vmatprep.subr.bf16.mxu1 %v2025_v57 }
  0xe8   :  { %905 = vmatpush1.bf16.msra.mxu0 %v2032_v1 }
  0xe9   :  { %854 = vmatpush1.bf16.msra.mxu1 %v2023_v58  ;;  %906 = vmatprep.subr.bf16.mxu0 %v2037_v2 }
  0xea   :  { %855 = vmatprep.subr.bf16.mxu1 %v2028_v59 }
  0xec   :  { %907 = vmatpush1.bf16.msra.mxu0 %v2035_v3 }
  0xed   :  { %856 = vmatpush1.bf16.msra.mxu1 %v2026_v60  ;;  %908 = vmatprep.subr.bf16.mxu0 %v2040_v4 }
  0xee   :  { %857 = vmatprep.subr.bf16.mxu1 %v2031_v61 }
  0xf0   :  { %909 = vmatpush1.bf16.msra.mxu0 %v2038_v5 }
  0xf1   :  { %858 = vmatpush1.bf16.msra.mxu1 %v2029_v62  ;;  %910 = vmatprep.subr.bf16.mxu0 %v2043_v6 }
  0xf2   :  { %859 = vmatprep.subr.bf16.mxu1 %v2034_v63 }
  0xf4   :  { %911 = vmatpush1.bf16.msra.mxu0 %v2041_v7 }
  0xf5   :  { %860 = vmatpush1.bf16.msra.mxu1 %v2032_v1  ;;  %912 = vmatprep.subr.bf16.mxu0 %v2046_v8 }
  0xf6   :  { %861 = vmatprep.subr.bf16.mxu1 %v2037_v2 }
  0xf8   :  { %913 = vmatpush1.bf16.msra.mxu0 %v2044_v9 }
  0xf9   :  { %862 = vmatpush1.bf16.msra.mxu1 %v2035_v3  ;;  %914 = vmatprep.subr.bf16.mxu0 %v2049_v10 }
  0xfa   :  { %863 = vmatprep.subr.bf16.mxu1 %v2040_v4 }
  0xfc   :  { %915 = vmatpush1.bf16.msra.mxu0 %v2047_v11 }
  0xfd   :  { %864 = vmatpush1.bf16.msra.mxu1 %v2038_v5  ;;  %916 = vmatprep.subr.bf16.mxu0 %v2052_v12  ;;  %v2411_v5 = vmov 3  }
  0xfe   :  { %865 = vmatprep.subr.bf16.mxu1 %v2043_v6  ;;  %1970 = vset.pattern.permute.xlu1 %v2411_v5  ;;  %v2412_v6 = vmov 2  }
  0xff   :  { %1969 = vset.pattern.permute.xlu0 %v2412_v6 }
 0x100   :  { %917 = vmatpush1.bf16.msra.mxu0 %v2050_v13 }
 0x101   :  { %866 = vmatpush1.bf16.msra.mxu1 %v2041_v7  ;;  %918 = vmatprep.subr.bf16.mxu0 %v2055_v14 }
 0x102   :  { %867 = vmatprep.subr.bf16.mxu1 %v2046_v8 }
 0x104   :  { %919 = vmatpush1.bf16.msra.mxu0 %v2053_v15 }
 0x105   :  { %868 = vmatpush1.bf16.msra.mxu1 %v2044_v9  ;;  %920 = vmatprep.subr.bf16.mxu0 %v2058_v16 }
 0x106   :  { %869 = vmatprep.subr.bf16.mxu1 %v2049_v10 }
 0x108   :  { %921 = vmatpush1.bf16.msra.mxu0 %v2056_v17 }
 0x109   :  { %870 = vmatpush1.bf16.msra.mxu1 %v2047_v11  ;;  %922 = vmatprep.subr.bf16.mxu0 %v2061_v18 }
 0x10a   :  { %871 = vmatprep.subr.bf16.mxu1 %v2052_v12 }
 0x10c   :  { %923 = vmatpush1.bf16.msra.mxu0 %v2059_v19 }
 0x10d   :  { %872 = vmatpush1.bf16.msra.mxu1 %v2050_v13  ;;  %v635_v13 = vld [vmem:[#allocation2] sm:$0x1] }
 0x10e   :  { %873 = vmatprep.subr.bf16.mxu1 %v2055_v14  ;;  %v636_v14 = vsub.f32 0.0, %v635_v13 }
 0x111   :  { %874 = vmatpush1.bf16.msra.mxu1 %v2053_v15 }
 0x112   :  { %875 = vmatprep.subr.bf16.mxu1 %v2058_v16 }
 0x115   :  { %876 = vmatpush1.bf16.msra.mxu1 %v2056_v17  ;;  %v640_v17 = vrot.slane %v636_v14, %v2658_v23 }
 0x116   :  { %877 = vmatprep.subr.bf16.mxu1 %v2061_v18 }
 0x119   :  { %878 = vmatpush1.bf16.msra.mxu1 %v2059_v19 }
 0x196   :  { %v533_v29 = vpop.f32.mrb[0].mxu0  ;;  %v451_v30 = vpop.f32.mrb[0].mxu1 }
 0x197   :  { %v534_v31 = vadd.f32 %v533_v29, %v223_v26  ;;  %v452_v32 = vadd.f32 %v451_v30, %v207_v27  ;;  %v2670_v33 = vpop.f32.mrb[1].mxu0  ;;  %v453_v34 = vpop.f32.mrb[1].mxu1  ;;  %v1784_v27 = vld [vmem:[#allocation2 + $0x1] ss:$0 sm:$0xff] }
 0x198   :  { %v537_v35 = vpop.f32.mrb[2].mxu0  ;;  %v454_v36 = vadd.f32 %v453_v34, %v211_v28  ;;  %v455_v37 = vpop.f32.mrb[2].mxu1  ;;  %v2063_v34 = vld [vmem:[%s2825_s5] sm:$0xff]  }
 0x199   :  { %v538_v38 = vpop.f32.mrb[3].mxu0  ;;  %v889_v39 = vmul.f32 %v534_v31, %v452_v32  ;;  %v456_v40 = vpop.f32.mrb[3].mxu1  ;;  %v2413_v31 = vmov 1   ;;  %v2064_v35 = vld [vmem:[%s2825_s5 + $0x48] sm:$0xff]   ;;  %v2066_v37 = vld [vmem:[%s2825_s5 + $0x50] sm:$0xff]  }
 0x19a   :  { %v651_v41 = vmul.f32 %v454_v36, %v452_v32  ;;  %v2065_v36 = vld [vmem:[%s2825_s5 + $0x8] sm:$0xff]   ;;  %v2067_v38 = vld [vmem:[%s2825_s5 + $0x10] sm:$0xff]   ;;  %v2069_v40 = vld [vmem:[%s2825_s5 + $0x18] sm:$0xff]  }
 0x19b   :  { %v891_v42 = vpack.c.bf16 %v889_v39, %v889_v39  ;;  %v2068_v39 = vld [vmem:[%s2825_s5 + $0x58] sm:$0xff]  }
 0x19c   :  { %v653_v1 = vpack.c.bf16 %v651_v41, %v651_v41  ;;  %v2070_v41 = vld [vmem:[%s2825_s5 + $0x60] sm:$0xff]  }
 0x19d   :  { %924 = vmatprep.mubr.bf16.mxu0 %v891_v42  ;;  %v2071_v42 = vld [vmem:[%s2825_s5 + $0x20] sm:$0xff]  }
 0x1a2   :  { %v615_v50 = vpop.f32.mrb[4].mxu0 }
 0x1a3   :  { %v2678_v51 = vadd.f32 %v615_v50, %v239_v46  ;;  %v617_v52 = vpop.f32.mrb[5].mxu0  ;;  %v492_v53 = vpop.f32.mrb[4].mxu1  ;;  %v2075_v46 = vld [vmem:[%s2825_s5 + $0x30] sm:$0xff]  }
 0x1a4   :  { %v618_v54 = vadd.f32 %v617_v52, %v243_v47  ;;  %v619_v55 = vpop.f32.mrb[6].mxu0  ;;  %v493_v56 = vadd.f32 %v492_v53, %v215_v48  ;;  %v494_v57 = vpop.f32.mrb[5].mxu1  ;;  %v2076_v47 = vld [vmem:[%s2825_s5 + $0x78] sm:$0xff]  }
 0x1a5   :  { %v620_v58 = vpop.f32.mrb[7].mxu0  ;;  %v495_v59 = vadd.f32 %v494_v57, %v219_v49  ;;  %v496_v60 = vpop.f32.mrb[6].mxu1  ;;  %v2077_v48 = vld [vmem:[%s2825_s5 + $0x38] sm:$0xff]  }
 0x1a6   :  { %v622_v61 = vmul.f32 %v618_v54, %v618_v54  ;;  %v652_v62 = vmul.f32 %v493_v56, %v452_v32  ;;  %v497_v63 = vpop.f32.mrb[7].mxu1 }
 0x1a7   :  { %v888_v2 = vmul.f32 %v495_v59, %v452_v32  ;;  %v2062_v32 = vld [vmem:[%s2825_s5 + $0x40] sm:$0xff]  }
 0x1a8   :  { %624 = vrot.lane.b32.xlu0 %v622_v61, %s2410_s0  ;;  %v654_v3 = vpack.c.bf16 %v652_v62, %v652_v62  ;;  %1892 = vmatprep.subr.bf16.mxu1 %v2062_v32 }
 0x1a9   :  { %v890_v4 = vpack.c.bf16 %v888_v2, %v888_v2 }
 0x1aa   :  { %879 = vmatprep.mubr.bf16.mxu1 %v654_v3 }
 0x1ab   :  { %880 = vmatmul.mubr.bf16.vlgmr.msra.gmra.mrb[12].mxu1 %v653_v1  ;;  %925 = vmatmul.mubr.bf16.vlgmr.msra.gmra.mrb[8].mxu0 %v890_v4 }
 0x1ac   :  { %1893 = vmatpush3.bf16.msra.mxu1 %v2063_v34 }
 0x1ad   :  { %1894 = vmatprep.subr.bf16.mxu1 %v2064_v35 }
 0x1af   :  { %v2680_v7 = vpop.f32.mrb[8].mxu1 }
 0x1b0   :  { %v2682_v8 = vpop.f32.mrb[9].mxu1  ;;  %1895 = vmatpush3.bf16.msra.mxu1 %v2065_v36 }
 0x1b1   :  { %v578_v9 = vpop.f32.mrb[10].mxu1  ;;  %1896 = vmatprep.subr.bf16.mxu1 %v2066_v37 }
 0x1b2   :  { %v579_v10 = vpop.f32.mrb[11].mxu1 }
 0x1b4   :  { %1897 = vmatpush3.bf16.msra.mxu1 %v2067_v38 }
 0x1b5   :  { %1898 = vmatprep.subr.bf16.mxu1 %v2068_v39 }
 0x1b8   :  { %1899 = vmatpush3.bf16.msra.mxu1 %v2069_v40 }
 0x1b9   :  { %1900 = vmatprep.subr.bf16.mxu1 %v2070_v41 }
 0x1bc   :  { %1901 = vmatpush3.bf16.msra.mxu1 %v2071_v42 }
 0x1bd   :  { %1902 = vmatprep.subr.bf16.mxu1 %v2072_v43 }
 0x1c0   :  { %1903 = vmatpush3.bf16.msra.mxu1 %v2073_v44  ;;  %v2078_v44 = vld [vmem:[%s2827_s7] sm:$0xff]  }
 0x1c1   :  { %1904 = vmatprep.subr.bf16.mxu1 %v2074_v45 }
 0x1c4   :  { %1905 = vmatpush3.bf16.msra.mxu1 %v2075_v46  ;;  %v1817_v46 = vld [vmem:[#allocation9] ss:$0 sm:$0xff] }
 0x1c5   :  { %1906 = vmatprep.subr.bf16.mxu1 %v2076_v47 }
 0x1c8   :  { %1907 = vmatpush3.bf16.msra.mxu1 %v2077_v48 }
 0x21a   :  { %v625_v11 = vpop.permute.xlu0 %624 }
 0x21b   :  { %v627_v12 = vadd.f32 %v625_v11, %v622_v61 }
 0x21d   :  { %2150 = vrsqrt.f32 %v627_v12  ;;  %vm630_vm3 = vcmp.eq.f32.partialorder %v627_v12, inf  ;;  %v633_v18 = vand.u32 2147483648, %v627_v12  ;;  %vm632_vm4 = vcmp.eq.f32.partialorder %v627_v12, 0.0 }
 0x227   :  { %v2151_v15 = vpop.eup %2150 }
 0x228   :  { %v629_v16 = vmul.f32 %v2151_v15, %v627_v12  ;;  %v234_v15 = vsub.s32 7, %v2654_v21 }
 0x22a   :  { %v631_v19 = vsel %vm630_vm3, %v627_v12, %v629_v16 }
 0x22b   :  { %v634_v20 = vsel %vm632_vm4, %v633_v18, %v631_v19 }
 0x22c   :  { %v641_v22 = vmul.f32 %v640_v17, %v634_v20  ;;  %v235_v17 = vrot.slane %v2660_v24, %v234_v15  ;;  %v2101_v15 = vld [vmem:[#allocation13 + $0x50] ss:$8 sps:$4 sm:$0xff]  }
 0x22e   :  { %v642_v26 = vmul.f32 1.442695, %v641_v22  ;;  %v577_v22 = vadd.f32 %v2682_v8, %v235_v17  ;;  %v2104_v17 = vld [vmem:[#allocation13 + $0x60] ss:$8 sps:$4 sm:$0xff]  }
 0x230   :  { %2152 = vpow2.f32 %v642_v26 }
 0x23a   :  { %v2153_v28 = vpop.eup %2152 }
 0x23b   :  { %v649_v29 = vadd.f32 %v2153_v28, %v1784_v27  ;;  %v226_v27 = vsub.s32 5, %v2654_v21 }
 0x23d   :  { %v650_v30 = vmul.f32 0.35355338, %v649_v29  ;;  %v227_v32 = vrot.slane %v2660_v24, %v226_v27  ;;  %v2113_v27 = vld [vmem:[#allocation13 + $0x90] ss:$8 sps:$4 sm:$0xff]  }
 0x23f   :  { %964 = vperm.xlu1 %1970, %v650_v30   ;;  %959 = vperm.xlu0 %1969, %v650_v30   ;;  %v536_v8 = vadd.f32 %v2670_v33, %v227_v32  ;;  %v2079_v33 = vld [vmem:[%s2827_s7 + $0x8] sm:$0xff]  }
 0x240   :  { %v2124_v32 = vld [vmem:[#allocation13 + $0xc4] ss:$8 sps:$4 sm:$0xff]  }
 0x243   :  { %1971 = vset.pattern.permute.xlu1 %v2408_v0  ;;  %1973 = vset.pattern.permute.xlu0 %v2411_v5 }
 0x244   :  { %935 = vperm.xlu1 %1971, %v650_v30  }
 0x248   :  { %1972 = vset.pattern.permute.xlu1 %v2413_v31 }
 0x249   :  { %940 = vperm.xlu1 %1972, %v650_v30   ;;  %v230_v30 = vsub.s32 6, %v2654_v21 }
 0x24b   :  { %v231_v36 = vrot.slane %v2660_v24, %v230_v30  ;;  %v2414_v24 = vmov 0.0   ;;  %v2121_v30 = vld [vmem:[#allocation13 + $0xb4] ss:$8 sps:$4 sm:$0xff]  }
 0x24c   :  { %1939 = vmatprep.subr.bf16.mxu0 %v2414_v24  ;;  %1943 = vmatprep.mubr.msk.bf16.mxu0 %vm2415_vm7, %v2414_v24 }
 0x24d   :  { %v575_v40 = vadd.f32 %v2680_v7, %v231_v36  ;;  %1940 = vmatpush3.bf16.msra.mxu0 %v2078_v44  ;;  %v2082_v7 = vld [vmem:[%s2829_s9 + $0x4] ss:$8 sps:$4 sm:$0xff]   ;;  %v2140_v44 = vld [vmem:[%s2833_s13 + $0x58] sm:$0xff]  }
 0x24e   :  { %1941 = vmatprep.subr.bf16.mxu0 %v2414_v24  ;;  %v2125_v36 = vld [vmem:[#allocation13 + $0xd0] ss:$8 sps:$4 sm:$0xff]   ;;  %v2141_v24 = vld [vmem:[%s2833_s13 + $0x18] sm:$0xff]  }
 0x251   :  { %1942 = vmatpush3.bf16.msra.mxu0 %v2079_v33  ;;  %v2142_v33 = vld [vmem:[%s2833_s13 + $0x60] sm:$0xff]  }
 0x252   :  { %1269 = vmatprep.subr.bf16.mxu0 %v2082_v7  ;;  %v2143_v7 = vld [vmem:[%s2833_s13 + $0x20] sm:$0xff]  }
 0x27e   :  { %v881_v49 = vpop.f32.mrb[12].mxu1  ;;  %v926_v50 = vpop.f32.mrb[8].mxu0 }
 0x27f   :  { %v883_v52 = vpop.f32.mrb[13].mxu1  ;;  %v928_v53 = vpop.f32.mrb[9].mxu0 }
 0x280   :  { %v885_v54 = vpop.f32.mrb[14].mxu1  ;;  %v930_v55 = vpop.f32.mrb[10].mxu0 }
 0x281   :  { %v886_v56 = vpop.f32.mrb[15].mxu1  ;;  %v931_v57 = vpop.f32.mrb[11].mxu0  ;;  %v2080_v54 = vld [vmem:[%s2829_s9] ss:$8 sps:$4 sm:$0xff]  }
 0x282   :  { %v2085_v56 = vld [vmem:[%s2829_s9 + $0x14] ss:$8 sps:$4 sm:$0xff]   ;;  %v2083_v57 = vld [vmem:[%s2829_s9 + $0x10] ss:$8 sps:$4 sm:$0xff]  }
 0x2be   :  { %v965_v58 = vpop.permute.xlu1 %964  ;;  %v960_v59 = vpop.permute.xlu0 %959 }
 0x2bf   :  { %v967_v60 = vmul.f32 %v965_v58, %v928_v53  ;;  %v962_v61 = vmul.f32 %v960_v59, %v926_v50  ;;  %v2088_v58 = vld [vmem:[#allocation13 + $0x4] ss:$8 sps:$4 sm:$0xff]   ;;  %v1834_v59 = vld [vmem:[#allocation10] ss:$0 sm:$0xff] }
 0x2c1   :  { %v968_v62 = vsub.f32 %v962_v61, %v967_v60 }
 0x2c3   :  { %v969_v63 = vand.u32 2147483647, %v968_v62  ;;  %v936_v1 = vpop.permute.xlu1 %935  ;;  %vm975_vm5 = vcmp.ge.f32.partialorder %v968_v62, 0.0 }
 0x2c4   :  { %v938_v5 = vmul.f32 %v936_v1, %v881_v49 }
 0x2c5   :  { %v970_v2 = vsub.f32 0.0, %v969_v63 }
 0x2c7   :  { %v971_v3 = vmul.f32 1.442695, %v970_v2 }
 0x2c8   :  { %v941_v4 = vpop.permute.xlu1 %940 }
 0x2c9   :  { %2154 = vpow2.f32 %v971_v3  ;;  %v943_v6 = vmul.f32 %v941_v4, %v883_v52  ;;  %v2091_v4 = vld [vmem:[#allocation13 + $0x14] ss:$8 sps:$4 sm:$0xff]  }
 0x2cb   :  { %v944_v9 = vsub.f32 %v938_v5, %v943_v6  ;;  %v2089_v5 = vld [vmem:[#allocation13 + $0x10] ss:$8 sps:$4 sm:$0xff]   ;;  %v2094_v6 = vld [vmem:[#allocation13 + $0x24] ss:$8 sps:$4 sm:$0xff]  }
 0x2cd   :  { %v945_v10 = vand.u32 2147483647, %v944_v9  ;;  %vm951_vm6 = vcmp.ge.f32.partialorder %v944_v9, 0.0  ;;  %v2092_v9 = vld [vmem:[#allocation13 + $0x20] ss:$8 sps:$4 sm:$0xff]  }
 0x2cf   :  { %v946_v11 = vsub.f32 0.0, %v945_v10  ;;  %v2097_v10 = vld [vmem:[#allocation13 + $0x34] ss:$8 sps:$4 sm:$0xff]  }
 0x2d1   :  { %v947_v12 = vmul.f32 1.442695, %v946_v11  ;;  %v2095_v11 = vld [vmem:[#allocation13 + $0x30] ss:$8 sps:$4 sm:$0xff]  }
 0x2d3   :  { %v2155_v13 = vpop.eup %2154  ;;  %2156 = vpow2.f32 %v947_v12  ;;  %v2100_v12 = vld [vmem:[#allocation13 + $0x44] ss:$8 sps:$4 sm:$0xff]  }
 0x2d4   :  { %v973_v14 = vadd.f32 1.0, %v2155_v13  ;;  %v2098_v13 = vld [vmem:[#allocation13 + $0x40] ss:$8 sps:$4 sm:$0xff]  }
 0x2d6   :  { %2158 = vrcp.f32 %v973_v14  ;;  %v2103_v14 = vld [vmem:[#allocation13 + $0x54] ss:$8 sps:$4 sm:$0xff]  }
 0x2dd   :  { %v2157_v16 = vpop.eup %2156 }
 0x2de   :  { %v949_v18 = vadd.f32 1.0, %v2157_v16  ;;  %v2106_v16 = vld [vmem:[#allocation13 + $0x64] ss:$8 sps:$4 sm:$0xff]  }
 0x2e0   :  { %v2159_v19 = vpop.eup %2158  ;;  %2160 = vrcp.f32 %v949_v18  ;;  %v2109_v18 = vld [vmem:[#allocation13 + $0x74] ss:$8 sps:$4 sm:$0xff]  }
 0x2e1   :  { %v976_v20 = vsub.f32 1.0, %v2159_v19 }
 0x2e3   :  { %v977_v26 = vsel %vm975_vm5, %v2159_v19, %v976_v20  ;;  %v2107_v19 = vld [vmem:[#allocation13 + $0x70] ss:$8 sps:$4 sm:$0xff]   ;;  %v2112_v20 = vld [vmem:[#allocation13 + $0x84] ss:$8 sps:$4 sm:$0xff]  }
 0x2e4   :  { %v979_v28 = vsub.f32 1.0, %v977_v26  ;;  %v978_v29 = vmul.f32 %v977_v26, %v577_v22  ;;  %v2110_v22 = vld [vmem:[#allocation13 + $0x80] ss:$8 sps:$4 sm:$0xff]   ;;  %v2115_v26 = vld [vmem:[#allocation13 + $0x94] ss:$8 sps:$4 sm:$0xff]  }
 0x2e6   :  { %v980_v31 = vmul.f32 %v979_v28, %v2678_v51  ;;  %v2118_v28 = vld [vmem:[#allocation13 + $0xa4] ss:$8 sps:$4 sm:$0xff]  }
 0x2e8   :  { %v981_v34 = vadd.f32 %v980_v31, %v978_v29  ;;  %v2116_v29 = vld [vmem:[#allocation13 + $0xa0] ss:$8 sps:$4 sm:$0xff]   ;;  %v2119_v31 = vld [vmem:[#allocation13 + $0xb0] ss:$8 sps:$4 sm:$0xff]  }
 0x2ea   :  { %v2161_v35 = vpop.eup %2160  ;;  %v983_v37 = vpack.c.bf16 %v981_v34, %v981_v34  ;;  %v2122_v34 = vld [vmem:[#allocation13 + $0xc0] ss:$8 sps:$4 sm:$0xff]  }
 0x2eb   :  { %v952_v38 = vsub.f32 1.0, %v2161_v35 }
 0x2ec   :  { %1151 = vmatprep.mubr.bf16.mxu1 %v983_v37  ;;  %v2130_v37 = vld [vmem:[#allocation13 + $0xe4] ss:$8 sps:$4 sm:$0xff]  }
 0x2ed   :  { %v953_v39 = vsel %vm951_vm6, %v2161_v35, %v952_v38  ;;  %v2127_v35 = vld [vmem:[#allocation13 + $0xd4] ss:$8 sps:$4 sm:$0xff]   ;;  %v2128_v38 = vld [vmem:[#allocation13 + $0xe0] ss:$8 sps:$4 sm:$0xff]  }
 0x2ee   :  { %v954_v41 = vmul.f32 %v953_v39, %v536_v8  ;;  %v955_v42 = vsub.f32 1.0, %v953_v39  ;;  %v2133_v8 = vld [vmem:[#allocation13 + $0xf4] ss:$8 sps:$4 sm:$0xff]   ;;  %v2131_v39 = vld [vmem:[#allocation13 + $0xf0] ss:$8 sps:$4 sm:$0xff]  }
 0x2f0   :  { %v956_v21 = vmul.f32 %v955_v42, %v575_v40  ;;  %v2134_v40 = vld [vmem:[%s2833_s13 + $0x40] sm:$0xff]   ;;  %v2136_v42 = vld [vmem:[%s2833_s13 + $0x48] sm:$0xff]  }
 0x2f1   :  { %1917 = vmatprep.subr.bf16.mxu1 %v2134_v40 }
 0x2f2   :  { %v957_v43 = vadd.f32 %v956_v21, %v954_v41  ;;  %v2135_v41 = vld [vmem:[%s2833_s13] sm:$0xff]   ;;  %v2137_v21 = vld [vmem:[%s2833_s13 + $0x8] sm:$0xff]  }
 0x2f4   :  { %v982_v51 = vpack.c.bf16 %v957_v43, %v957_v43  ;;  %v2138_v43 = vld [vmem:[%s2833_s13 + $0x50] sm:$0xff]  }
 0x2f6   :  { %1152 = vmatmul.mubr.bf16.vlgmr.msra.gmra.mrb[16].mxu1 %v982_v51  ;;  %v2139_v51 = vld [vmem:[%s2833_s13 + $0x10] sm:$0xff]  }
 0x2f7   :  { %1918 = vmatpush3.bf16.msra.mxu1 %v2135_v41 }
 0x2f8   :  { %1919 = vmatprep.subr.bf16.mxu1 %v2136_v42 }
 0x2fb   :  { %1920 = vmatpush3.bf16.msra.mxu1 %v2137_v21 }
 0x2fc   :  { %1921 = vmatprep.subr.bf16.mxu1 %v2138_v43 }
 0x2ff   :  { %1922 = vmatpush3.bf16.msra.mxu1 %v2139_v51 }
 0x300   :  { %1923 = vmatprep.subr.bf16.mxu1 %v2140_v44 }
 0x303   :  { %1924 = vmatpush3.bf16.msra.mxu1 %v2141_v24 }
 0x304   :  { %1925 = vmatprep.subr.bf16.mxu1 %v2142_v33 }
 0x307   :  { %1926 = vmatpush3.bf16.msra.mxu1 %v2143_v7 }
 0x3c9   :  { %v1908_v45 = vpop.f32.mrb[16].mxu1 }
 0x3ca   :  { %v1909_v47 = vpop.f32.mrb[17].mxu1 }
 0x3cb   :  { %v1910_v48 = vadd.f32 %v1909_v47, %v1908_v45  ;;  %v1911_v49 = vpop.f32.mrb[18].mxu1  ;;  %v2144_v45 = vld [vmem:[%s2833_s13 + $0x68] sm:$0xff]   ;;  %v1234_v47 = vld [vmem:[#allocation12] sm:$0x3] }
 0x3cc   :  { %v1912_v50 = vpop.f32.mrb[19].mxu1  ;;  %1927 = vmatprep.subr.bf16.mxu1 %v2144_v45  ;;  %v1243_v49 = vrot.slane %v1234_v47, %v2663_v25 }
 0x3cd   :  { %v1154_v52 = vadd.f32 %v1910_v48, %v1817_v46  ;;  %v2145_v46 = vld [vmem:[%s2833_s13 + $0x28] sm:$0xff]   ;;  %v1239_v48 = vrot.slane %v1234_v47, %v2658_v23 }
 0x3ce   :  { %1928 = vmatpush3.bf16.msra.mxu1 %v2145_v46 }
 0x3cf   :  { %v1159_v53 = vmax.f32 %v1154_v52, 0.0 }
 0x3d1   :  { %v1160_v55 = vpack.c.bf16 %v1159_v53, %v1159_v53 }
 0x3d3   :  { %1944 = vmatmul.mubr.msk.bf16.vlgmr.msra.gmra.mrb[12].mxu0 %vm1184_vm8, %v1160_v55 }
 0x3d4   :  { %1270 = vmatpush1.bf16.msra.mxu0 %v2080_v54  ;;  %1301 = vmatprep.mubr.bf16.mxu0 %v2408_v0  ;;  %v2086_v0 = vld [vmem:[#allocation13] ss:$8 sps:$4 sm:$0xff]  }
 0x3d5   :  { %1271 = vmatprep.subr.bf16.mxu0 %v2085_v56 }
 0x3d8   :  { %1272 = vmatpush1.bf16.msra.mxu0 %v2083_v57 }
 0x3d9   :  { %1518 = vmatprep.subr.bf16.mxu0 %v2088_v58 }
 0x4a6   :  { %v1222_v60 = vpop.f32.mrb[12].mxu0 }
 0x4a7   :  { %v1223_v61 = vadd.f32 %v1834_v59, %v1222_v60  ;;  %v1945_v62 = vpop.f32.mrb[13].mxu0 }
 0x4a8   :  { %v1225_v63 = vpop.f32.mrb[14].mxu0  ;;  %v2147_v62 = vld [vmem:[%s2833_s13 + $0x30] sm:$0xff]  }
 0x4a9   :  { %v1228_v1 = vmax.f32 %v1223_v61, 0.0  ;;  %v1946_v2 = vpop.f32.mrb[15].mxu0  ;;  %v2146_v61 = vld [vmem:[%s2833_s13 + $0x70] sm:$0xff]   ;;  %v2148_v63 = vld [vmem:[%s2833_s13 + $0x78] sm:$0xff]  }
 0x4aa   :  { %1929 = vmatprep.subr.bf16.mxu1 %v2146_v61  ;;  %v1346_v2 = vld [vmem:[#allocation15] sm:$0x3] }
 0x4ab   :  { %v1229_v3 = vpack.c.bf16 %v1228_v1, %v1228_v1  ;;  %1930 = vmatpush3.bf16.msra.mxu1 %v2147_v62  ;;  %v2149_v1 = vld [vmem:[%s2833_s13 + $0x38] sm:$0xff]  }
 0x4ac   :  { %1931 = vmatprep.subr.bf16.mxu1 %v2148_v63 }
 0x4ad   :  { %1842 = vmatmul.mubr.msk.bf16.vlgmr.msra.gmra.mrb[16].mxu0 %vm1184_vm8, %v1229_v3  ;;  %v1355_v3 = vrot.slane %v1346_v2, %v2663_v25 }
 0x4ae   :  { %1519 = vmatpush1.bf16.msra.mxu0 %v2086_v0  ;;  %v1351_v0 = vrot.slane %v1346_v2, %v2658_v23 }
 0x4af   :  { %1520 = vmatprep.subr.bf16.mxu0 %v2091_v4  ;;  %1932 = vmatpush3.bf16.msra.mxu1 %v2149_v1 }
 0x4b2   :  { %1521 = vmatpush1.bf16.msra.mxu0 %v2089_v5 }
 0x4b3   :  { %1522 = vmatprep.subr.bf16.mxu0 %v2094_v6 }
 0x4b6   :  { %1523 = vmatpush1.bf16.msra.mxu0 %v2092_v9 }
 0x4b7   :  { %1524 = vmatprep.subr.bf16.mxu0 %v2097_v10 }
 0x4ba   :  { %1525 = vmatpush1.bf16.msra.mxu0 %v2095_v11 }
 0x4bb   :  { %1526 = vmatprep.subr.bf16.mxu0 %v2100_v12 }
 0x4be   :  { %1527 = vmatpush1.bf16.msra.mxu0 %v2098_v13 }
 0x4bf   :  { %1528 = vmatprep.subr.bf16.mxu0 %v2103_v14 }
 0x4c2   :  { %1529 = vmatpush1.bf16.msra.mxu0 %v2101_v15 }
 0x4c3   :  { %1530 = vmatprep.subr.bf16.mxu0 %v2106_v16 }
 0x4c6   :  { %1531 = vmatpush1.bf16.msra.mxu0 %v2104_v17  ;;  %v1875_v17 = vld [vmem:[#allocation16] ss:$0 sm:$0xff] }
 0x4c7   :  { %1532 = vmatprep.subr.bf16.mxu0 %v2109_v18 }
 0x4ca   :  { %1533 = vmatpush1.bf16.msra.mxu0 %v2107_v19 }
 0x4cb   :  { %1534 = vmatprep.subr.bf16.mxu0 %v2112_v20 }
 0x4ce   :  { %1535 = vmatpush1.bf16.msra.mxu0 %v2110_v22 }
 0x4cf   :  { %1536 = vmatprep.subr.bf16.mxu0 %v2115_v26 }
 0x4d2   :  { %1537 = vmatpush1.bf16.msra.mxu0 %v2113_v27 }
 0x4d3   :  { %1538 = vmatprep.subr.bf16.mxu0 %v2118_v28 }
 0x4d6   :  { %1539 = vmatpush1.bf16.msra.mxu0 %v2116_v29 }
 0x4d7   :  { %1540 = vmatprep.subr.bf16.mxu0 %v2121_v30 }
 0x4da   :  { %1541 = vmatpush1.bf16.msra.mxu0 %v2119_v31 }
 0x4db   :  { %1542 = vmatprep.subr.bf16.mxu0 %v2124_v32 }
 0x4de   :  { %1543 = vmatpush1.bf16.msra.mxu0 %v2122_v34 }
 0x4df   :  { %1544 = vmatprep.subr.bf16.mxu0 %v2127_v35 }
 0x4e2   :  { %1545 = vmatpush1.bf16.msra.mxu0 %v2125_v36 }
 0x4e3   :  { %1546 = vmatprep.subr.bf16.mxu0 %v2130_v37 }
 0x4e6   :  { %1547 = vmatpush1.bf16.msra.mxu0 %v2128_v38 }
 0x4e7   :  { %1548 = vmatprep.subr.bf16.mxu0 %v2133_v8 }
 0x4ea   :  { %1549 = vmatpush1.bf16.msra.mxu0 %v2131_v39 }
 0x580   :  { %v1303_v50 = vpop.f32.mrb[16].mxu0 }
 0x581   :  { %v1304_v52 = vadd.f32 %v1303_v50, %v1239_v48  ;;  %v1305_v53 = vpop.f32.mrb[17].mxu0 }
 0x582   :  { %v1306_v54 = vadd.f32 %v1305_v53, %v1243_v49  ;;  %v1307_v55 = vpop.f32.mrb[18].mxu0 }
 0x583   :  { %v1310_v56 = vmax.f32 %v1304_v52, 0.0  ;;  %v1308_v57 = vpop.f32.mrb[19].mxu0 }
 0x584   :  { %v1311_v58 = vmax.f32 %v1306_v54, 0.0 }
 0x585   :  { %v1312_v60 = vpack.c.bf16 %v1310_v56, %v1310_v56 }
 0x586   :  { %v1313_v59 = vpack.c.bf16 %v1311_v58, %v1311_v58 }
 0x588   :  { %1550 = vmatprep.mubr.bf16.mxu0 %v1313_v59 }
 0x589   :  { %1551 = vmatmul.mubr.bf16.vlgmr.msra.gmra.mrb[20].mxu0 %v1312_v60 }
 0x65c   :  { %v1552_v4 = vpop.f32.mrb[20].mxu0 }
 0x65d   :  { %v1553_v5 = vadd.f32 %v1552_v4, %v1351_v0  ;;  %v1554_v6 = vpop.f32.mrb[21].mxu0 }
 0x65e   :  { %v1555_v9 = vadd.f32 %v1554_v6, %v1355_v3  ;;  %v1556_v10 = vpop.f32.mrb[22].mxu0 }
 0x65f   :  { %v1559_v11 = vmax.f32 %v1553_v5, 0.0  ;;  %v1557_v12 = vpop.f32.mrb[23].mxu0 }
 0x660   :  { %v1560_v13 = vmax.f32 %v1555_v9, 0.0 }
 0x661   :  { %v1561_v15 = vpack.c.bf16 %v1559_v11, %v1559_v11 }
 0x662   :  { %v1562_v14 = vpack.c.bf16 %v1560_v13, %v1560_v13 }
 0x664   :  { %1730 = vmatprep.mubr.bf16.mxu1 %v1562_v14 }
 0x665   :  { %1731 = vmatmul.mubr.bf16.vlgmr.msra.gmra.mrb[20].mxu1 %v1561_v15 }
 0x738   :  { %v1933_v16 = vpop.f32.mrb[20].mxu1 }
 0x739   :  { %v1934_v18 = vpop.f32.mrb[21].mxu1 }
 0x73a   :  { %v1935_v19 = vadd.f32 %v1934_v18, %v1933_v16  ;;  %v1936_v20 = vpop.f32.mrb[22].mxu1 }
 0x73b   :  { %v1937_v23 = vpop.f32.mrb[23].mxu1 }
 0x73c   :  { %v1733_v22 = vadd.f32 %v1935_v19, %v1875_v17 }
 0x73e   :  { %1738 = vst [vmem:[%s2835_s15] sm:$0xff] %v1733_v22 }
 0x73f   :  { %1743 = vsyncpa [#allocation3], 1 }
 0x740   :  { %1744 = vsyncpa [#allocation5], 1 }
 0x741   :  { %1745 = vsyncpa [#allocation8], 1 }
 0x742   :  { %1746 = vsyncpa [#allocation11], 1 }
 0x743   :  { %1747 = vsyncpa [#allocation14], 1 }
 0x744   :  { %1748 = vsyncpa [#allocation17], 1 }

</bundles_post_ra>
